<compile_context>
chip_gen: v7x
topology: tpu7x:2x2x1
jax: 0.10.0
libtpu: 0.0.40
codegen_flags: <defaults>
</compile_context>

<pallas_src>
import jax
import jax.numpy as jnp
from jax.experimental import pallas as pl
from jax.experimental.pallas import tpu as pltpu

# ----------------------------- config ------------------------------------
B = 2                    # batch (pad to a multiple of 8 in real use for vreg occupancy)
S = 8                    # src seq len == opt.padding (rel_mlp output dim)
JUMP = 3                 # opt.jump
MAX_SEQ_LEN = JUMP + 1
D_MODEL = 32
ENT_DIM = 32             # == d_model so cosine_similarity(enc_output, entityE(...)) is valid
REL_DIM = 16
STATE_DIM = 32
ACTION_DIM = REL_DIM + ENT_DIM
MLP_IN = STATE_DIM + ENT_DIM + REL_DIM
MLP_HID = 32
N_SRC_VOCAB = 16
N_TRG_VOCAB = 16
VOCAB = max(N_SRC_VOCAB, N_TRG_VOCAB)
NUM_REL = 5
R_PAD = NUM_REL * 2
SRC_PAD_IDX = 0
GAMA = 0.7
TAB_ROWS = 16            # every embedding table padded to this many rows (one shared one-hot iota)

assert TAB_ROWS == N_TRG_VOCAB == VOCAB

# ------------------------- packed parameter layouts -------------------------
# Weight slab: bf16, 128 lanes, each block starts on a 16-row boundary (bf16 tile height).
_W_SPECS = (
    ("ent_tab",  (TAB_ROWS, ENT_DIM)),          # entityE table (vocab rows)
    ("rel_tab",  (TAB_ROWS, REL_DIM)),          # relationE table (11 real rows, zero-padded)
    ("src_tab",  (N_SRC_VOCAB, D_MODEL)),
    ("trg_tab",  (N_TRG_VOCAB, D_MODEL)),
    ("enc_w",    (D_MODEL, D_MODEL)),
    ("dec_wqkv", (D_MODEL, 3 * D_MODEL)),       # fused Wq|Wk|Wv
    ("prj_w",    (D_MODEL + ENT_DIM, N_TRG_VOCAB)),   # trg_word_prj on [dec|agent], no bias
    ("lstm_w",   (ACTION_DIM, 4 * STATE_DIM)),  # W_ih (W_hh term is 0 since hx0 = 0)
    ("mlp_w1",   (MLP_IN, MLP_HID)),
    ("mlp_w2",   (MLP_HID, ENT_DIM)),
    ("rel_w",    (JUMP * N_TRG_VOCAB, S)),
)


def _build_w_layout(specs, align=16):
    layout, off = {}, 0
    for name, (r, c) in specs:
        layout[name] = (off, r, c)
        off += -(-r // align) * align
    return layout, -(-off // align) * align


W_LAYOUT, W_ROWS = _build_w_layout(_W_SPECS)          # -> 400 rows x 128 lanes bf16 (~100 KiB)

# Bias slab: f32, one row per bias, 128 lanes.
_B_SPECS = (("enc_b", D_MODEL), ("lstm_b", 4 * STATE_DIM),
            ("mlp_b1", MLP_HID), ("mlp_b2", ENT_DIM), ("rel_b", S))
B_LAYOUT = {name: (i, c) for i, (name, c) in enumerate(_B_SPECS)}
B_ROWS = 8

# int32 control slab column layout: [src_seq(S) | cur_rel | q_ent | q_rel | trg(4)]
CTRL_COLS = S + 3 + 4


# ------------------------------ fused kernel -------------------------------
def fused_translator_kernel(ctrl_ref, tf_ref, w_ref, b_ref, logits_ref):
    f32, bf16 = jnp.float32, jnp.bfloat16
    Bk = ctrl_ref.shape[0]

    def W(name):                                  # static slice of the bf16 weight slab
        off, r, c = W_LAYOUT[name]
        return w_ref[off:off + r, :c]

    def bias(name):                               # static slice of the f32 bias slab
        row, c = B_LAYOUT[name]
        return b_ref[row:row + 1, :c]

    def mxu(a, w_bf16):                           # bf16 MXU operands, f32 accumulation
        return jnp.dot(a.astype(bf16), w_bf16, preferred_element_type=f32)

    # ---------------- unpack the packed input slabs (static slices) ----------------
    ctrl = ctrl_ref[...]                          # (B, 15) int32
    src_seq = ctrl[:, 0:S]
    cur_rel = ctrl[:, S:S + 1]
    q_ent = ctrl[:, S + 1:S + 2]
    q_rel = ctrl[:, S + 2:S + 3]
    trg0 = ctrl[:, S + 3:S + 4]                   # trg[:, 0]
    init_tok = ctrl[:, S + 5:S + 6]               # trg[:, 2]  (init_seq)

    tf = tf_ref[...]                              # (B, S+2, D) f32
    enc_tf = tf[:, 0:S, :].reshape(Bk * S, D_MODEL)
    cur_tf = tf[:, S:S + 1, :].reshape(Bk, D_MODEL)
    temp_tf = tf[:, S + 1:S + 2, :].reshape(Bk, D_MODEL)

    # hoisted iotas (JAX does not CSE broadcast_in_dim across the unrolled decode loop)
    iota16 = jax.lax.broadcasted_iota(jnp.int32, (Bk, TAB_ROWS), 1)
    iota16_f = iota16.astype(f32)

    def gather_rows(idx_col, table_bf16):         # exact one-hot matmul gather (MXU)
        oh = (iota16 == idx_col).astype(bf16)
        return jnp.dot(oh, table_bf16, preferred_element_type=f32)

    ent_tab = W("ent_tab")
    rel_tab = W("rel_tab")

    # ---------------- HistoryEncoder (LSTMCell, hx0 = cx0 = 0) + NO_OP mask ----------------
    cur_emb = gather_rows(src_seq[:, 0:1], ent_tab) + cur_tf      # entityE(current, dt)
    rel_emb = gather_rows(cur_rel, rel_tab)                       # relationE(current_relation)
    q_ent_emb = gather_rows(q_ent, ent_tab)                       # entityE(query, dt=0)
    q_rel_emb = gather_rows(q_rel, rel_tab)                       # relationE(query)

    lstm_w = W("lstm_w")                                          # (ACTION_DIM, 4H) bf16
    # prev_action = [rel_emb | cur_emb]; hx0 == 0 so the W_hh recurrent term is exactly zero.
    gates = (mxu(rel_emb, lstm_w[:REL_DIM, :])
             + mxu(cur_emb, lstm_w[REL_DIM:, :])
             + bias("lstm_b"))                                    # (B, 4H) f32
    H = STATE_DIM
    i_g = jax.nn.sigmoid(gates[:, 0:H])
    # f gate multiplies cx0 == 0 -> skipped
    g_g = jnp.tanh(gates[:, 2 * H:3 * H])
    o_g = jax.nn.sigmoid(gates[:, 3 * H:4 * H])
    h_new = o_g * jnp.tanh(i_g * g_g)                             # c_new = i*g (cx0 = 0)
    no_op = (cur_rel == R_PAD).astype(f32)                        # (B,1) 1.0 where NO_OP
    lstm_out = h_new * (1.0 - no_op)                              # keep old hx (== 0) on NO_OP

    # ------------------------------ PolicyMLP -------------------------------
    mlp_w1 = W("mlp_w1")
    h1 = jnp.maximum(
        mxu(lstm_out, mlp_w1[:STATE_DIM, :])
        + mxu(q_ent_emb, mlp_w1[STATE_DIM:STATE_DIM + ENT_DIM, :])
        + mxu(q_rel_emb, mlp_w1[STATE_DIM + ENT_DIM:, :])
        + bias("mlp_b1"), 0.0)
    agent = mxu(h1, W("mlp_w2")) + bias("mlp_b2")                 # (B, ENT_DIM)

    # ------------- synthetic model.encoder: emb + time feat, relu proj -------
    iota_src = jax.lax.broadcasted_iota(jnp.int32, (Bk, S, N_SRC_VOCAB), 2)
    src_oh = (iota_src == src_seq[:, :, None]).astype(bf16)       # (B,S,V) exact one-hot
    src_emb = jnp.dot(src_oh.reshape(Bk * S, N_SRC_VOCAB), W("src_tab"),
                      preferred_element_type=f32)                 # (B*S, D)
    enc_flat = jnp.maximum(mxu(src_emb + enc_tf, W("enc_w")) + bias("enc_b"), 0.0)
    enc3 = enc_flat.reshape(Bk, S, D_MODEL)                       # (B,S,D)

    # ------------------ decoder constants (computed once) -------------------
    wqkv = W("dec_wqkv")                                          # (D, 3D) bf16
    prj_w = W("prj_w")                                            # (D+ENT, V) bf16
    prj_dec = prj_w[:D_MODEL, :]
    k3 = mxu(enc_flat, wqkv[:, D_MODEL:2 * D_MODEL]).reshape(Bk, S, D_MODEL)
    v3 = mxu(enc_flat, wqkv[:, 2 * D_MODEL:]).reshape(Bk, S, D_MODEL)
    agent_logits = mxu(agent, prj_w[D_MODEL:, :])                 # agent part, reused per step
    trg_tab = W("trg_tab")
    # Fold the trg embedding into the Q / projection weights once: each decode step is
    # then a single one-hot matmul on the serial tok -> argmax -> tok chain.
    w_tq = jnp.dot(trg_tab, wqkv[:, :D_MODEL], preferred_element_type=f32).astype(bf16)
    w_tprj = jnp.dot(trg_tab, prj_dec, preferred_element_type=f32).astype(bf16)

    valid = src_seq != SRC_PAD_IDX                                # get_pad_mask (hoisted, reused)
    att_bias = jnp.where(valid, 0.0, -1e9).astype(f32)            # hoisted attention mask
    inv_sqrt_d = 1.0 / (D_MODEL ** 0.5)
    rel_w = W("rel_w")                                            # (JUMP*V, S) bf16

    def first_argmax(x):                                          # torch .topk(1): lowest index on ties
        mx = jnp.max(x, axis=-1, keepdims=True)
        return jnp.min(jnp.where(x >= mx, iota16_f, float(N_TRG_VOCAB)),
                       axis=-1, keepdims=True).astype(jnp.int32)  # (B,1)

    # -------- greedy decode loop (L=1 per step, fully VMEM-resident) --------
    scores_rel = jnp.zeros((Bk, S), f32)
    tok = init_tok                                                # gen_seq[:, 0] = trg[:, 2]
    for step in range(JUMP):                                      # unrolled (JUMP = 3)
        oh = (iota16 == tok).astype(bf16)                         # (B, V) token one-hot
        q = jnp.dot(oh, w_tq, preferred_element_type=f32)         # == trg_emb @ Wq
        tok_logits = jnp.dot(oh, w_tprj, preferred_element_type=f32)  # residual path (off crit-path)
        att = jnp.sum(q[:, None, :] * k3, axis=-1) * inv_sqrt_d + att_bias   # (B, S) on the VPU
        att = att - jnp.max(att, axis=-1, keepdims=True)
        e = jnp.exp(att)
        p_att = e * pl.reciprocal(jnp.sum(e, axis=-1, keepdims=True), approx=True)
        ctx = jnp.sum(p_att[:, :, None] * v3, axis=1)             # (B, D) on the VPU
        lv = mxu(ctx, prj_dec) + tok_logits + agent_logits        # trg_word_prj([dec|agent])
        lv = lv - jnp.max(lv, axis=-1, keepdims=True)
        ev = jnp.exp(lv)
        p_vocab = ev * pl.reciprocal(jnp.sum(ev, axis=-1, keepdims=True), approx=True)
        # rel_mlp(dec_output.reshape(B, L*V)) accumulated per position (no concat needed)
        scores_rel = scores_rel + mxu(
            p_vocab, rel_w[step * N_TRG_VOCAB:(step + 1) * N_TRG_VOCAB, :])
        if step < JUMP - 1:                                       # last step's token is never used
            tok = first_argmax(p_vocab)                           # gen_seq[:, step+1]
    scores_rel = scores_rel + bias("rel_b")

    # ---------------- scores_ent: cosine similarity vs entityE(trg[:,0]) -----
    temp = gather_rows(trg0, ent_tab) + temp_tf                   # (B, D)
    dots = jnp.sum(enc3 * temp[:, None, :], axis=-1)              # (B, S)
    n1sq = jnp.sum(enc3 * enc3, axis=-1)                          # (B, S)
    n2sq = jnp.sum(temp * temp, axis=-1, keepdims=True)           # (B, 1)
    scores_ent = dots * jax.lax.rsqrt(jnp.maximum(n1sq * n2sq, 1e-16))

    # ---------------- masked_fill + log_softmax --------------------
    scores_all = GAMA * scores_ent + (1.0 - GAMA) * scores_rel
    scores_all = jnp.where(valid, scores_all, -1e10)
    m = jnp.max(scores_all, axis=-1, keepdims=True)
    sh = scores_all - m
    lse = jnp.log(jnp.sum(jnp.exp(sh), axis=-1, keepdims=True))
    logits_ref[...] = sh - lse                                    # log_softmax(scores_all)


# ------------------------------ forward ------------------------------------
def translator_forward(params, query_timestamps, src_seq, src_time_seq,
                       current_relation, query_entity, query_relation, trg, rng_key):
    batch_size = trg.shape[0]
    qts = query_timestamps.reshape(batch_size, 1)

    # Sinusoidal time features precomputed here (tiny fused elementwise XLA op);
    # jnp.sin is kept out of Mosaic. Packed into ONE slab -> one DMA.
    enc_tf = jnp.sin((qts - src_time_seq)[..., None] * params['inv_freq_src'])          # (B,S,D)
    cur_tf = jnp.sin((qts[:, 0] - src_time_seq[:, 0])[:, None] * params['inv_freq_ent'])
    temp_tf = jnp.sin((qts[:, 0] - trg[:, -1].astype(jnp.float32))[:, None]
                      * params['inv_freq_ent'])
    tf_slab = jnp.concatenate([enc_tf, cur_tf[:, None, :], temp_tf[:, None, :]], axis=1)

    # One int32 control slab: [src_seq | current_relation | query_entity | query_relation | trg]
    ctrl = jnp.concatenate([
        src_seq.astype(jnp.int32),
        current_relation.reshape(batch_size, 1).astype(jnp.int32),
        query_entity.reshape(batch_size, 1).astype(jnp.int32),
        query_relation.reshape(batch_size, 1).astype(jnp.int32),
        trg.astype(jnp.int32)], axis=1)                            # (B, CTRL_COLS)

    vm = pl.BlockSpec(memory_space=pltpu.MemorySpace.VMEM)
    logits = pl.pallas_call(
        fused_translator_kernel,
        out_shape=jax.ShapeDtypeStruct((batch_size, S), jnp.float32),
        in_specs=[vm, vm, vm, vm],
        out_specs=vm,
    )(ctrl, tf_slab, params['w_slab'], params['b_slab'])

    # TODO(synk): torch.multinomial(action_prob, 1) is stateful sampling; use stateless
    # jax.random.categorical on the log-probs (same distribution).
    action_id = jax.random.categorical(rng_key, logits, axis=-1)[:, None]        # (B, 1)
    loss = -jnp.take_along_axis(logits, action_id, axis=1)[:, 0]                 # -sum(logits*one_hot)
    return loss, logits, action_id


# --------------------------- deterministic params --------------------------
def init_params(key):
    ks = iter(jax.random.split(key, 24))
    n = lambda shape, s=0.1: s * jax.random.normal(next(ks), shape, jnp.float32)
    raw = dict(
        ent_tab=n((VOCAB, ENT_DIM)),
        rel_tab=n((2 * NUM_REL + 1, REL_DIM)),            # 11 real rows, zero-padded to TAB_ROWS
        src_tab=n((N_SRC_VOCAB, D_MODEL)),
        trg_tab=n((N_TRG_VOCAB, D_MODEL)),
        enc_w=n((D_MODEL, D_MODEL)),
        dec_wqkv=n((D_MODEL, 3 * D_MODEL)),
        prj_w=n((D_MODEL + ENT_DIM, N_TRG_VOCAB)),
        lstm_w=n((ACTION_DIM, 4 * STATE_DIM)),
        mlp_w1=n((MLP_IN, MLP_HID)),
        mlp_w2=n((MLP_HID, ENT_DIM)),
        rel_w=n((JUMP * N_TRG_VOCAB, S)),
    )
    biases = dict(
        enc_b=n((D_MODEL,)), lstm_b=n((4 * STATE_DIM,)),
        mlp_b1=n((MLP_HID,)), mlp_b2=n((ENT_DIM,)), rel_b=n((S,)),
    )
    # Pack all weights into ONE 128-lane bf16 slab (pre-cast once -> half the DMA bytes,
    # no per-use converts in the kernel), and all biases into ONE small f32 slab.
    w_slab = jnp.zeros((W_ROWS, 128), jnp.float32)
    for name, (off, _r, _c) in W_LAYOUT.items():
        w = raw[name]
        w_slab = w_slab.at[off:off + w.shape[0], :w.shape[1]].set(w)
    w_slab = w_slab.astype(jnp.bfloat16)
    b_slab = jnp.zeros((B_ROWS, 128), jnp.float32)
    for name, (row, c) in B_LAYOUT.items():
        b_slab = b_slab.at[row, :c].set(biases[name])
    return dict(
        w_slab=w_slab, b_slab=b_slab,
        inv_freq_src=jnp.exp(-jnp.arange(D_MODEL, dtype=jnp.float32) / D_MODEL)[None, :],
        inv_freq_ent=jnp.exp(-jnp.arange(ENT_DIM, dtype=jnp.float32) / ENT_DIM)[None, :],
        # NOTE: score_weighted_fc is initialized in the reference __init__ but never used in forward.
    )


# --------------------------------- main -------------------------------------
if __name__ == "__main__":
    root = jax.random.PRNGKey(0)
    kp, k1, k2, k3, k4, k5, ksamp = jax.random.split(root, 7)
    params = init_params(kp)

    src_seq = jax.random.randint(k1, (B, S), 1, N_SRC_VOCAB).astype(jnp.int32)
    src_seq = src_seq.at[:, -2:].set(SRC_PAD_IDX)                 # pad tail positions
    src_time_seq = jax.random.randint(k2, (B, S), 0, 10).astype(jnp.float32)
    query_timestamps = jnp.array([12.0, 15.0], jnp.float32)
    current_relation = jnp.array([R_PAD, 3], jnp.int32)           # one NO_OP entry
    query_entity = jax.random.randint(k3, (B,), 1, N_SRC_VOCAB).astype(jnp.int32)
    query_relation = jax.random.randint(k4, (B,), 0, 2 * NUM_REL).astype(jnp.int32)
    trg = jax.random.randint(k5, (B, 4), 1, N_TRG_VOCAB).astype(jnp.int32)

    fwd = jax.jit(translator_forward)
    loss, logits, action_id = fwd(params, query_timestamps, src_seq, src_time_seq,
                                  current_relation, query_entity, query_relation, trg, ksamp)

    jax.block_until_ready((loss, logits, action_id))
    assert loss.shape == (B,) and logits.shape == (B, S) and action_id.shape == (B, 1)
    print("KERNEL_OK")
</pallas_src>

<mosaic_0001>
module attributes {stable_mosaic.version = 11 : i64} {
  func.func @fused_translator_kernel(%arg0: memref<2x15xi32, #tpu.memory_space<vmem>>, %arg1: memref<2x10x32xf32, #tpu.memory_space<vmem>>, %arg2: memref<400x128xbf16, #tpu.memory_space<vmem>>, %arg3: memref<8x128xf32, #tpu.memory_space<vmem>>, %arg4: memref<2x8xf32, #tpu.memory_space<vmem>>) attributes {dimension_semantics = [], scalar_prefetch = 0 : i64, scratch_operands = 0 : i64, tpu.core_type = #tpu.core_type<tc>} {
    %c0 = arith.constant 0 : index
    %c0_0 = arith.constant 0 : index
    %0 = vector.load %arg0[%c0, %c0_0] : memref<2x15xi32, #tpu.memory_space<vmem>>, vector<2x15xi32>
    %1 = vector.extract_strided_slice %0 {offsets = [0, 0], sizes = [2, 8], strides = [1, 1]} : vector<2x15xi32> to vector<2x8xi32>
    %2 = vector.extract_strided_slice %0 {offsets = [0, 8], sizes = [2, 1], strides = [1, 1]} : vector<2x15xi32> to vector<2x1xi32>
    %3 = vector.extract_strided_slice %0 {offsets = [0, 9], sizes = [2, 1], strides = [1, 1]} : vector<2x15xi32> to vector<2x1xi32>
    %4 = vector.extract_strided_slice %0 {offsets = [0, 10], sizes = [2, 1], strides = [1, 1]} : vector<2x15xi32> to vector<2x1xi32>
    %5 = vector.extract_strided_slice %0 {offsets = [0, 11], sizes = [2, 1], strides = [1, 1]} : vector<2x15xi32> to vector<2x1xi32>
    %6 = vector.extract_strided_slice %0 {offsets = [0, 13], sizes = [2, 1], strides = [1, 1]} : vector<2x15xi32> to vector<2x1xi32>
    %c0_1 = arith.constant 0 : index
    %c0_2 = arith.constant 0 : index
    %c0_3 = arith.constant 0 : index
    %7 = vector.load %arg1[%c0_1, %c0_2, %c0_3] : memref<2x10x32xf32, #tpu.memory_space<vmem>>, vector<2x10x32xf32>
    %8 = vector.extract_strided_slice %7 {offsets = [0, 0, 0], sizes = [2, 8, 32], strides = [1, 1, 1]} : vector<2x10x32xf32> to vector<2x8x32xf32>
    %9 = vector.shape_cast %8 : vector<2x8x32xf32> to vector<16x32xf32>
    %10 = vector.extract_strided_slice %7 {offsets = [0, 8, 0], sizes = [2, 1, 32], strides = [1, 1, 1]} : vector<2x10x32xf32> to vector<2x1x32xf32>
    %11 = vector.shape_cast %10 : vector<2x1x32xf32> to vector<2x32xf32>
    %12 = vector.extract_strided_slice %7 {offsets = [0, 9, 0], sizes = [2, 1, 32], strides = [1, 1, 1]} : vector<2x10x32xf32> to vector<2x1x32xf32>
    %13 = vector.shape_cast %12 : vector<2x1x32xf32> to vector<2x32xf32>
    %14 = tpu.iota {dimensions = array<i32: 1>} : vector<2x16xi32>
    %15 = arith.sitofp %14 : vector<2x16xi32> to vector<2x16xf32>
    %c0_4 = arith.constant 0 : index
    %c0_5 = arith.constant 0 : index
    %16 = vector.load %arg2[%c0_4, %c0_5] : memref<400x128xbf16, #tpu.memory_space<vmem>>, vector<16x32xbf16>
    %c16 = arith.constant 16 : index
    %c0_6 = arith.constant 0 : index
    %17 = vector.load %arg2[%c16, %c0_6] : memref<400x128xbf16, #tpu.memory_space<vmem>>, vector<16x16xbf16>
    %18 = vector.extract_strided_slice %1 {offsets = [0, 0], sizes = [2, 1], strides = [1, 1]} : vector<2x8xi32> to vector<2x1xi32>
    %19 = vector.broadcast %18 : vector<2x1xi32> to vector<2x16xi32>
    %20 = arith.cmpi eq, %14, %19 : vector<2x16xi32>
    %21 = arith.extui %20 : vector<2x16xi1> to vector<2x16xi32>
    %22 = arith.sitofp %21 : vector<2x16xi32> to vector<2x16xf32>
    %23 = arith.truncf %22 : vector<2x16xf32> to vector<2x16xbf16>
    %cst = arith.constant dense<0.000000e+00> : vector<2x32xf32>
    %24 = tpu.matmul %23, %16, %cst {dimension_numbers = #tpu.dot_dimension_numbers<[1], [0], [0], [1], [0, 0, 1, 1], [], []>} : vector<2x16xbf16>, vector<16x32xbf16>, vector<2x32xf32> -> vector<2x32xf32>
    %25 = arith.addf %24, %11 : vector<2x32xf32>
    %26 = vector.broadcast %2 : vector<2x1xi32> to vector<2x16xi32>
    %27 = arith.cmpi eq, %14, %26 : vector<2x16xi32>
    %28 = arith.extui %27 : vector<2x16xi1> to vector<2x16xi32>
    %29 = arith.sitofp %28 : vector<2x16xi32> to vector<2x16xf32>
    %30 = arith.truncf %29 : vector<2x16xf32> to vector<2x16xbf16>
    %cst_7 = arith.constant dense<0.000000e+00> : vector<2x16xf32>
    %31 = tpu.matmul %30, %17, %cst_7 {dimension_numbers = #tpu.dot_dimension_numbers<[1], [0], [0], [1], [0, 0, 1, 1], [], []>} : vector<2x16xbf16>, vector<16x16xbf16>, vector<2x16xf32> -> vector<2x16xf32>
    %32 = vector.broadcast %3 : vector<2x1xi32> to vector<2x16xi32>
    %33 = arith.cmpi eq, %14, %32 : vector<2x16xi32>
    %34 = arith.extui %33 : vector<2x16xi1> to vector<2x16xi32>
    %35 = arith.sitofp %34 : vector<2x16xi32> to vector<2x16xf32>
    %36 = arith.truncf %35 : vector<2x16xf32> to vector<2x16xbf16>
    %cst_8 = arith.constant dense<0.000000e+00> : vector<2x32xf32>
    %37 = tpu.matmul %36, %16, %cst_8 {dimension_numbers = #tpu.dot_dimension_numbers<[1], [0], [0], [1], [0, 0, 1, 1], [], []>} : vector<2x16xbf16>, vector<16x32xbf16>, vector<2x32xf32> -> vector<2x32xf32>
    %38 = vector.broadcast %4 : vector<2x1xi32> to vector<2x16xi32>
    %39 = arith.cmpi eq, %14, %38 : vector<2x16xi32>
    %40 = arith.extui %39 : vector<2x16xi1> to vector<2x16xi32>
    %41 = arith.sitofp %40 : vector<2x16xi32> to vector<2x16xf32>
    %42 = arith.truncf %41 : vector<2x16xf32> to vector<2x16xbf16>
    %cst_9 = arith.constant dense<0.000000e+00> : vector<2x16xf32>
    %43 = tpu.matmul %42, %17, %cst_9 {dimension_numbers = #tpu.dot_dimension_numbers<[1], [0], [0], [1], [0, 0, 1, 1], [], []>} : vector<2x16xbf16>, vector<16x16xbf16>, vector<2x16xf32> -> vector<2x16xf32>
    %c192 = arith.constant 192 : index
    %c0_10 = arith.constant 0 : index
    %44 = vector.load %arg2[%c192, %c0_10] : memref<400x128xbf16, #tpu.memory_space<vmem>>, vector<48x128xbf16>
    %45 = vector.extract_strided_slice %44 {offsets = [0, 0], sizes = [16, 128], strides = [1, 1]} : vector<48x128xbf16> to vector<16x128xbf16>
    %46 = arith.truncf %31 : vector<2x16xf32> to vector<2x16xbf16>
    %cst_11 = arith.constant dense<0.000000e+00> : vector<2x128xf32>
    %47 = tpu.matmul %46, %45, %cst_11 {dimension_numbers = #tpu.dot_dimension_numbers<[1], [0], [0], [1], [0, 0, 1, 1], [], []>} : vector<2x16xbf16>, vector<16x128xbf16>, vector<2x128xf32> -> vector<2x128xf32>
    %48 = vector.extract_strided_slice %44 {offsets = [16, 0], sizes = [32, 128], strides = [1, 1]} : vector<48x128xbf16> to vector<32x128xbf16>
    %49 = arith.truncf %25 : vector<2x32xf32> to vector<2x32xbf16>
    %cst_12 = arith.constant dense<0.000000e+00> : vector<2x128xf32>
    %50 = tpu.matmul %49, %48, %cst_12 {dimension_numbers = #tpu.dot_dimension_numbers<[1], [0], [0], [1], [0, 0, 1, 1], [], []>} : vector<2x32xbf16>, vector<32x128xbf16>, vector<2x128xf32> -> vector<2x128xf32>
    %51 = arith.addf %47, %50 : vector<2x128xf32>
    %c1 = arith.constant 1 : index
    %c0_13 = arith.constant 0 : index
    %52 = vector.load %arg3[%c1, %c0_13] : memref<8x128xf32, #tpu.memory_space<vmem>>, vector<1x128xf32>
    %53 = vector.broadcast %52 : vector<1x128xf32> to vector<2x128xf32>
    %54 = arith.addf %51, %53 : vector<2x128xf32>
    %55 = vector.extract_strided_slice %54 {offsets = [0, 0], sizes = [2, 32], strides = [1, 1]} : vector<2x128xf32> to vector<2x32xf32>
    %56 = arith.negf %55 : vector<2x32xf32>
    %57 = math.exp %56 : vector<2x32xf32>
    %cst_14 = arith.constant 1.000000e+00 : f32
    %58 = vector.broadcast %cst_14 : f32 to vector<2x32xf32>
    %59 = arith.addf %58, %57 : vector<2x32xf32>
    %60 = arith.divf %58, %59 : vector<2x32xf32>
    %61 = vector.extract_strided_slice %54 {offsets = [0, 64], sizes = [2, 32], strides = [1, 1]} : vector<2x128xf32> to vector<2x32xf32>
    %62 = math.tanh %61 : vector<2x32xf32>
    %63 = vector.extract_strided_slice %54 {offsets = [0, 96], sizes = [2, 32], strides = [1, 1]} : vector<2x128xf32> to vector<2x32xf32>
    %64 = arith.negf %63 : vector<2x32xf32>
    %65 = math.exp %64 : vector<2x32xf32>
    %cst_15 = arith.constant 1.000000e+00 : f32
    %66 = vector.broadcast %cst_15 : f32 to vector<2x32xf32>
    %67 = arith.addf %66, %65 : vector<2x32xf32>
    %68 = arith.divf %66, %67 : vector<2x32xf32>
    %69 = arith.mulf %60, %62 : vector<2x32xf32>
    %70 = math.tanh %69 : vector<2x32xf32>
    %71 = arith.mulf %68, %70 : vector<2x32xf32>
    %c10_i32 = arith.constant 10 : i32
    %72 = vector.broadcast %c10_i32 : i32 to vector<2x1xi32>
    %73 = arith.cmpi eq, %2, %72 : vector<2x1xi32>
    %74 = arith.extui %73 : vector<2x1xi1> to vector<2x1xi32>
    %75 = arith.sitofp %74 : vector<2x1xi32> to vector<2x1xf32>
    %cst_16 = arith.constant 1.000000e+00 : f32
    %76 = vector.broadcast %cst_16 : f32 to vector<2x1xf32>
    %77 = arith.subf %76, %75 : vector<2x1xf32>
    %78 = vector.broadcast %77 : vector<2x1xf32> to vector<2x32xf32>
    %79 = arith.mulf %71, %78 : vector<2x32xf32>
    %c240 = arith.constant 240 : index
    %c0_17 = arith.constant 0 : index
    %80 = vector.load %arg2[%c240, %c0_17] : memref<400x128xbf16, #tpu.memory_space<vmem>>, vector<80x32xbf16>
    %81 = vector.extract_strided_slice %80 {offsets = [0, 0], sizes = [32, 32], strides = [1, 1]} : vector<80x32xbf16> to vector<32x32xbf16>
    %82 = arith.truncf %79 : vector<2x32xf32> to vector<2x32xbf16>
    %cst_18 = arith.constant dense<0.000000e+00> : vector<2x32xf32>
    %83 = tpu.matmul %82, %81, %cst_18 {dimension_numbers = #tpu.dot_dimension_numbers<[1], [0], [0], [1], [0, 0, 1, 1], [], []>} : vector<2x32xbf16>, vector<32x32xbf16>, vector<2x32xf32> -> vector<2x32xf32>
    %84 = vector.extract_strided_slice %80 {offsets = [32, 0], sizes = [32, 32], strides = [1, 1]} : vector<80x32xbf16> to vector<32x32xbf16>
    %85 = arith.truncf %37 : vector<2x32xf32> to vector<2x32xbf16>
    %cst_19 = arith.constant dense<0.000000e+00> : vector<2x32xf32>
    %86 = tpu.matmul %85, %84, %cst_19 {dimension_numbers = #tpu.dot_dimension_numbers<[1], [0], [0], [1], [0, 0, 1, 1], [], []>} : vector<2x32xbf16>, vector<32x32xbf16>, vector<2x32xf32> -> vector<2x32xf32>
    %87 = arith.addf %83, %86 : vector<2x32xf32>
    %88 = vector.extract_strided_slice %80 {offsets = [64, 0], sizes = [16, 32], strides = [1, 1]} : vector<80x32xbf16> to vector<16x32xbf16>
    %89 = arith.truncf %43 : vector<2x16xf32> to vector<2x16xbf16>
    %cst_20 = arith.constant dense<0.000000e+00> : vector<2x32xf32>
    %90 = tpu.matmul %89, %88, %cst_20 {dimension_numbers = #tpu.dot_dimension_numbers<[1], [0], [0], [1], [0, 0, 1, 1], [], []>} : vector<2x16xbf16>, vector<16x32xbf16>, vector<2x32xf32> -> vector<2x32xf32>
    %91 = arith.addf %87, %90 : vector<2x32xf32>
    %c2 = arith.constant 2 : index
    %c0_21 = arith.constant 0 : index
    %92 = vector.load %arg3[%c2, %c0_21] : memref<8x128xf32, #tpu.memory_space<vmem>>, vector<1x32xf32>
    %93 = vector.broadcast %92 : vector<1x32xf32> to vector<2x32xf32>
    %94 = arith.addf %91, %93 : vector<2x32xf32>
    %cst_22 = arith.constant 0.000000e+00 : f32
    %95 = vector.broadcast %cst_22 : f32 to vector<2x32xf32>
    %96 = arith.maximumf %94, %95 : vector<2x32xf32>
    %c320 = arith.constant 320 : index
    %c0_23 = arith.constant 0 : index
    %97 = vector.load %arg2[%c320, %c0_23] : memref<400x128xbf16, #tpu.memory_space<vmem>>, vector<32x32xbf16>
    %98 = arith.truncf %96 : vector<2x32xf32> to vector<2x32xbf16>
    %cst_24 = arith.constant dense<0.000000e+00> : vector<2x32xf32>
    %99 = tpu.matmul %98, %97, %cst_24 {dimension_numbers = #tpu.dot_dimension_numbers<[1], [0], [0], [1], [0, 0, 1, 1], [], []>} : vector<2x32xbf16>, vector<32x32xbf16>, vector<2x32xf32> -> vector<2x32xf32>
    %c3 = arith.constant 3 : index
    %c0_25 = arith.constant 0 : index
    %100 = vector.load %arg3[%c3, %c0_25] : memref<8x128xf32, #tpu.memory_space<vmem>>, vector<1x32xf32>
    %101 = vector.broadcast %100 : vector<1x32xf32> to vector<2x32xf32>
    %102 = arith.addf %99, %101 : vector<2x32xf32>
    %103 = tpu.iota {dimensions = array<i32: 2>} : vector<2x8x16xi32>
    %104 = vector.shape_cast %1 : vector<2x8xi32> to vector<2x8x1xi32>
    %105 = vector.broadcast %104 : vector<2x8x1xi32> to vector<2x8x16xi32>
    %106 = arith.cmpi eq, %103, %105 : vector<2x8x16xi32>
    %107 = arith.extui %106 : vector<2x8x16xi1> to vector<2x8x16xi32>
    %108 = arith.sitofp %107 : vector<2x8x16xi32> to vector<2x8x16xf32>
    %109 = arith.truncf %108 : vector<2x8x16xf32> to vector<2x8x16xbf16>
    %110 = vector.shape_cast %109 : vector<2x8x16xbf16> to vector<16x16xbf16>
    %c32 = arith.constant 32 : index
    %c0_26 = arith.constant 0 : index
    %111 = vector.load %arg2[%c32, %c0_26] : memref<400x128xbf16, #tpu.memory_space<vmem>>, vector<16x32xbf16>
    %cst_27 = arith.constant dense<0.000000e+00> : vector<16x32xf32>
    %112 = tpu.matmul %110, %111, %cst_27 {dimension_numbers = #tpu.dot_dimension_numbers<[1], [0], [0], [1], [0, 0, 1, 1], [], []>} : vector<16x16xbf16>, vector<16x32xbf16>, vector<16x32xf32> -> vector<16x32xf32>
    %113 = arith.addf %112, %9 : vector<16x32xf32>
    %c64 = arith.constant 64 : index
    %c0_28 = arith.constant 0 : index
    %114 = vector.load %arg2[%c64, %c0_28] : memref<400x128xbf16, #tpu.memory_space<vmem>>, vector<32x32xbf16>
    %115 = arith.truncf %113 : vector<16x32xf32> to vector<16x32xbf16>
    %cst_29 = arith.constant dense<0.000000e+00> : vector<16x32xf32>
    %116 = tpu.matmul %115, %114, %cst_29 {dimension_numbers = #tpu.dot_dimension_numbers<[1], [0], [0], [1], [0, 0, 1, 1], [], []>} : vector<16x32xbf16>, vector<32x32xbf16>, vector<16x32xf32> -> vector<16x32xf32>
    %c0_30 = arith.constant 0 : index
    %c0_31 = arith.constant 0 : index
    %117 = vector.load %arg3[%c0_30, %c0_31] : memref<8x128xf32, #tpu.memory_space<vmem>>, vector<1x32xf32>
    %118 = vector.broadcast %117 : vector<1x32xf32> to vector<16x32xf32>
    %119 = arith.addf %116, %118 : vector<16x32xf32>
    %cst_32 = arith.constant 0.000000e+00 : f32
    %120 = vector.broadcast %cst_32 : f32 to vector<16x32xf32>
    %121 = arith.maximumf %119, %120 : vector<16x32xf32>
    %122 = vector.shape_cast %121 : vector<16x32xf32> to vector<2x8x32xf32>
    %c96 = arith.constant 96 : index
    %c0_33 = arith.constant 0 : index
    %123 = vector.load %arg2[%c96, %c0_33] : memref<400x128xbf16, #tpu.memory_space<vmem>>, vector<32x96xbf16>
    %c128 = arith.constant 128 : index
    %c0_34 = arith.constant 0 : index
    %124 = vector.load %arg2[%c128, %c0_34] : memref<400x128xbf16, #tpu.memory_space<vmem>>, vector<64x16xbf16>
    %125 = vector.extract_strided_slice %124 {offsets = [0, 0], sizes = [32, 16], strides = [1, 1]} : vector<64x16xbf16> to vector<32x16xbf16>
    %126 = vector.extract_strided_slice %123 {offsets = [0, 32], sizes = [32, 32], strides = [1, 1]} : vector<32x96xbf16> to vector<32x32xbf16>
    %127 = arith.truncf %121 : vector<16x32xf32> to vector<16x32xbf16>
    %cst_35 = arith.constant dense<0.000000e+00> : vector<16x32xf32>
    %128 = tpu.matmul %127, %126, %cst_35 {dimension_numbers = #tpu.dot_dimension_numbers<[1], [0], [0], [1], [0, 0, 1, 1], [], []>} : vector<16x32xbf16>, vector<32x32xbf16>, vector<16x32xf32> -> vector<16x32xf32>
    %129 = vector.shape_cast %128 : vector<16x32xf32> to vector<2x8x32xf32>
    %130 = vector.extract_strided_slice %123 {offsets = [0, 64], sizes = [32, 32], strides = [1, 1]} : vector<32x96xbf16> to vector<32x32xbf16>
    %131 = arith.truncf %121 : vector<16x32xf32> to vector<16x32xbf16>
    %cst_36 = arith.constant dense<0.000000e+00> : vector<16x32xf32>
    %132 = tpu.matmul %131, %130, %cst_36 {dimension_numbers = #tpu.dot_dimension_numbers<[1], [0], [0], [1], [0, 0, 1, 1], [], []>} : vector<16x32xbf16>, vector<32x32xbf16>, vector<16x32xf32> -> vector<16x32xf32>
    %133 = vector.shape_cast %132 : vector<16x32xf32> to vector<2x8x32xf32>
    %134 = vector.extract_strided_slice %124 {offsets = [32, 0], sizes = [32, 16], strides = [1, 1]} : vector<64x16xbf16> to vector<32x16xbf16>
    %135 = arith.truncf %102 : vector<2x32xf32> to vector<2x32xbf16>
    %cst_37 = arith.constant dense<0.000000e+00> : vector<2x16xf32>
    %136 = tpu.matmul %135, %134, %cst_37 {dimension_numbers = #tpu.dot_dimension_numbers<[1], [0], [0], [1], [0, 0, 1, 1], [], []>} : vector<2x32xbf16>, vector<32x16xbf16>, vector<2x16xf32> -> vector<2x16xf32>
    %c48 = arith.constant 48 : index
    %c0_38 = arith.constant 0 : index
    %137 = vector.load %arg2[%c48, %c0_38] : memref<400x128xbf16, #tpu.memory_space<vmem>>, vector<16x32xbf16>
    %138 = vector.extract_strided_slice %123 {offsets = [0, 0], sizes = [32, 32], strides = [1, 1]} : vector<32x96xbf16> to vector<32x32xbf16>
    %cst_39 = arith.constant dense<0.000000e+00> : vector<16x32xf32>
    %139 = tpu.matmul %137, %138, %cst_39 {dimension_numbers = #tpu.dot_dimension_numbers<[1], [0], [0], [1], [0, 0, 1, 1], [], []>} : vector<16x32xbf16>, vector<32x32xbf16>, vector<16x32xf32> -> vector<16x32xf32>
    %140 = arith.truncf %139 : vector<16x32xf32> to vector<16x32xbf16>
    %cst_40 = arith.constant dense<0.000000e+00> : vector<16x16xf32>
    %141 = tpu.matmul %137, %125, %cst_40 {dimension_numbers = #tpu.dot_dimension_numbers<[1], [0], [0], [1], [0, 0, 1, 1], [], []>} : vector<16x32xbf16>, vector<32x16xbf16>, vector<16x16xf32> -> vector<16x16xf32>
    %142 = arith.truncf %141 : vector<16x16xf32> to vector<16x16xbf16>
    %c0_i32 = arith.constant 0 : i32
    %143 = vector.broadcast %c0_i32 : i32 to vector<2x8xi32>
    %144 = arith.cmpi ne, %1, %143 : vector<2x8xi32>
    %cst_41 = arith.constant 0.000000e+00 : f32
    %cst_42 = arith.constant -1.000000e+09 : f32
    %145 = vector.broadcast %cst_41 : f32 to vector<2x8xf32>
    %146 = vector.broadcast %cst_42 : f32 to vector<2x8xf32>
    %147 = arith.select %144, %145, %146 : vector<2x8xi1>, vector<2x8xf32>
    %c352 = arith.constant 352 : index
    %c0_43 = arith.constant 0 : index
    %148 = vector.load %arg2[%c352, %c0_43] : memref<400x128xbf16, #tpu.memory_space<vmem>>, vector<48x8xbf16>
    %cst_44 = arith.constant 0.000000e+00 : f32
    %149 = vector.broadcast %cst_44 : f32 to vector<2x8xf32>
    %150 = vector.broadcast %6 : vector<2x1xi32> to vector<2x16xi32>
    %151 = arith.cmpi eq, %14, %150 : vector<2x16xi32>
    %152 = arith.extui %151 : vector<2x16xi1> to vector<2x16xi32>
    %153 = arith.sitofp %152 : vector<2x16xi32> to vector<2x16xf32>
    %154 = arith.truncf %153 : vector<2x16xf32> to vector<2x16xbf16>
    %cst_45 = arith.constant dense<0.000000e+00> : vector<2x32xf32>
    %155 = tpu.matmul %154, %140, %cst_45 {dimension_numbers = #tpu.dot_dimension_numbers<[1], [0], [0], [1], [0, 0, 1, 1], [], []>} : vector<2x16xbf16>, vector<16x32xbf16>, vector<2x32xf32> -> vector<2x32xf32>
    %cst_46 = arith.constant dense<0.000000e+00> : vector<2x16xf32>
    %156 = tpu.matmul %154, %142, %cst_46 {dimension_numbers = #tpu.dot_dimension_numbers<[1], [0], [0], [1], [0, 0, 1, 1], [], []>} : vector<2x16xbf16>, vector<16x16xbf16>, vector<2x16xf32> -> vector<2x16xf32>
    %157 = vector.shape_cast %155 : vector<2x32xf32> to vector<2x1x32xf32>
    %158 = vector.broadcast %157 : vector<2x1x32xf32> to vector<2x8x32xf32>
    %159 = arith.mulf %158, %129 : vector<2x8x32xf32>
    %cst_47 = arith.constant dense<0.000000e+00> : vector<2x8xf32>
    %160 = vector.multi_reduction <add>, %159, %cst_47 [2] : vector<2x8x32xf32> to vector<2x8xf32>
    %cst_48 = arith.constant 0.176776692 : f32
    %161 = vector.broadcast %cst_48 : f32 to vector<2x8xf32>
    %162 = arith.mulf %160, %161 : vector<2x8xf32>
    %163 = arith.addf %162, %147 : vector<2x8xf32>
    %cst_49 = arith.constant dense<0xFF800000> : vector<2xf32>
    %164 = vector.multi_reduction <maximumf>, %163, %cst_49 [1] : vector<2x8xf32> to vector<2xf32>
    %165 = vector.shape_cast %164 : vector<2xf32> to vector<2x1xf32>
    %166 = vector.broadcast %165 : vector<2x1xf32> to vector<2x8xf32>
    %167 = arith.subf %163, %166 : vector<2x8xf32>
    %168 = math.exp %167 : vector<2x8xf32>
    %cst_50 = arith.constant dense<0.000000e+00> : vector<2xf32>
    %169 = vector.multi_reduction <add>, %168, %cst_50 [1] : vector<2x8xf32> to vector<2xf32>
    %170 = vector.shape_cast %169 : vector<2xf32> to vector<2x1xf32>
    %171 = tpu.reciprocal %170 {approx = true} : vector<2x1xf32> -> vector<2x1xf32>
    %172 = vector.broadcast %171 : vector<2x1xf32> to vector<2x8xf32>
    %173 = arith.mulf %168, %172 : vector<2x8xf32>
    %174 = vector.shape_cast %173 : vector<2x8xf32> to vector<2x8x1xf32>
    %175 = vector.broadcast %174 : vector<2x8x1xf32> to vector<2x8x32xf32>
    %176 = arith.mulf %175, %133 : vector<2x8x32xf32>
    %cst_51 = arith.constant dense<0.000000e+00> : vector<2x32xf32>
    %177 = vector.multi_reduction <add>, %176, %cst_51 [1] : vector<2x8x32xf32> to vector<2x32xf32>
    %178 = arith.truncf %177 : vector<2x32xf32> to vector<2x32xbf16>
    %cst_52 = arith.constant dense<0.000000e+00> : vector<2x16xf32>
    %179 = tpu.matmul %178, %125, %cst_52 {dimension_numbers = #tpu.dot_dimension_numbers<[1], [0], [0], [1], [0, 0, 1, 1], [], []>} : vector<2x32xbf16>, vector<32x16xbf16>, vector<2x16xf32> -> vector<2x16xf32>
    %180 = arith.addf %179, %156 : vector<2x16xf32>
    %181 = arith.addf %180, %136 : vector<2x16xf32>
    %cst_53 = arith.constant dense<0xFF800000> : vector<2xf32>
    %182 = vector.multi_reduction <maximumf>, %181, %cst_53 [1] : vector<2x16xf32> to vector<2xf32>
    %183 = vector.shape_cast %182 : vector<2xf32> to vector<2x1xf32>
    %184 = vector.broadcast %183 : vector<2x1xf32> to vector<2x16xf32>
    %185 = arith.subf %181, %184 : vector<2x16xf32>
    %186 = math.exp %185 : vector<2x16xf32>
    %cst_54 = arith.constant dense<0.000000e+00> : vector<2xf32>
    %187 = vector.multi_reduction <add>, %186, %cst_54 [1] : vector<2x16xf32> to vector<2xf32>
    %188 = vector.shape_cast %187 : vector<2xf32> to vector<2x1xf32>
    %189 = tpu.reciprocal %188 {approx = true} : vector<2x1xf32> -> vector<2x1xf32>
    %190 = vector.broadcast %189 : vector<2x1xf32> to vector<2x16xf32>
    %191 = arith.mulf %186, %190 : vector<2x16xf32>
    %192 = vector.extract_strided_slice %148 {offsets = [0, 0], sizes = [16, 8], strides = [1, 1]} : vector<48x8xbf16> to vector<16x8xbf16>
    %193 = arith.truncf %191 : vector<2x16xf32> to vector<2x16xbf16>
    %cst_55 = arith.constant dense<0.000000e+00> : vector<2x8xf32>
    %194 = tpu.matmul %193, %192, %cst_55 {dimension_numbers = #tpu.dot_dimension_numbers<[1], [0], [0], [1], [0, 0, 1, 1], [], []>} : vector<2x16xbf16>, vector<16x8xbf16>, vector<2x8xf32> -> vector<2x8xf32>
    %195 = arith.addf %149, %194 : vector<2x8xf32>
    %cst_56 = arith.constant dense<0xFF800000> : vector<2xf32>
    %196 = vector.multi_reduction <maximumf>, %191, %cst_56 [1] : vector<2x16xf32> to vector<2xf32>
    %197 = vector.shape_cast %196 : vector<2xf32> to vector<2x1xf32>
    %198 = vector.broadcast %197 : vector<2x1xf32> to vector<2x16xf32>
    %199 = arith.cmpf oge, %191, %198 : vector<2x16xf32>
    %cst_57 = arith.constant 1.600000e+01 : f32
    %200 = vector.broadcast %cst_57 : f32 to vector<2x16xf32>
    %201 = arith.select %199, %15, %200 : vector<2x16xi1>, vector<2x16xf32>
    %cst_58 = arith.constant dense<0x7F800000> : vector<2xf32>
    %202 = vector.multi_reduction <minimumf>, %201, %cst_58 [1] : vector<2x16xf32> to vector<2xf32>
    %203 = vector.shape_cast %202 : vector<2xf32> to vector<2x1xf32>
    %204 = arith.fptosi %203 : vector<2x1xf32> to vector<2x1xi32>
    %205 = vector.broadcast %204 : vector<2x1xi32> to vector<2x16xi32>
    %206 = arith.cmpi eq, %14, %205 : vector<2x16xi32>
    %207 = arith.extui %206 : vector<2x16xi1> to vector<2x16xi32>
    %208 = arith.sitofp %207 : vector<2x16xi32> to vector<2x16xf32>
    %209 = arith.truncf %208 : vector<2x16xf32> to vector<2x16xbf16>
    %cst_59 = arith.constant dense<0.000000e+00> : vector<2x32xf32>
    %210 = tpu.matmul %209, %140, %cst_59 {dimension_numbers = #tpu.dot_dimension_numbers<[1], [0], [0], [1], [0, 0, 1, 1], [], []>} : vector<2x16xbf16>, vector<16x32xbf16>, vector<2x32xf32> -> vector<2x32xf32>
    %cst_60 = arith.constant dense<0.000000e+00> : vector<2x16xf32>
    %211 = tpu.matmul %209, %142, %cst_60 {dimension_numbers = #tpu.dot_dimension_numbers<[1], [0], [0], [1], [0, 0, 1, 1], [], []>} : vector<2x16xbf16>, vector<16x16xbf16>, vector<2x16xf32> -> vector<2x16xf32>
    %212 = vector.shape_cast %210 : vector<2x32xf32> to vector<2x1x32xf32>
    %213 = vector.broadcast %212 : vector<2x1x32xf32> to vector<2x8x32xf32>
    %214 = arith.mulf %213, %129 : vector<2x8x32xf32>
    %cst_61 = arith.constant dense<0.000000e+00> : vector<2x8xf32>
    %215 = vector.multi_reduction <add>, %214, %cst_61 [2] : vector<2x8x32xf32> to vector<2x8xf32>
    %cst_62 = arith.constant 0.176776692 : f32
    %216 = vector.broadcast %cst_62 : f32 to vector<2x8xf32>
    %217 = arith.mulf %215, %216 : vector<2x8xf32>
    %218 = arith.addf %217, %147 : vector<2x8xf32>
    %cst_63 = arith.constant dense<0xFF800000> : vector<2xf32>
    %219 = vector.multi_reduction <maximumf>, %218, %cst_63 [1] : vector<2x8xf32> to vector<2xf32>
    %220 = vector.shape_cast %219 : vector<2xf32> to vector<2x1xf32>
    %221 = vector.broadcast %220 : vector<2x1xf32> to vector<2x8xf32>
    %222 = arith.subf %218, %221 : vector<2x8xf32>
    %223 = math.exp %222 : vector<2x8xf32>
    %cst_64 = arith.constant dense<0.000000e+00> : vector<2xf32>
    %224 = vector.multi_reduction <add>, %223, %cst_64 [1] : vector<2x8xf32> to vector<2xf32>
    %225 = vector.shape_cast %224 : vector<2xf32> to vector<2x1xf32>
    %226 = tpu.reciprocal %225 {approx = true} : vector<2x1xf32> -> vector<2x1xf32>
    %227 = vector.broadcast %226 : vector<2x1xf32> to vector<2x8xf32>
    %228 = arith.mulf %223, %227 : vector<2x8xf32>
    %229 = vector.shape_cast %228 : vector<2x8xf32> to vector<2x8x1xf32>
    %230 = vector.broadcast %229 : vector<2x8x1xf32> to vector<2x8x32xf32>
    %231 = arith.mulf %230, %133 : vector<2x8x32xf32>
    %cst_65 = arith.constant dense<0.000000e+00> : vector<2x32xf32>
    %232 = vector.multi_reduction <add>, %231, %cst_65 [1] : vector<2x8x32xf32> to vector<2x32xf32>
    %233 = arith.truncf %232 : vector<2x32xf32> to vector<2x32xbf16>
    %cst_66 = arith.constant dense<0.000000e+00> : vector<2x16xf32>
    %234 = tpu.matmul %233, %125, %cst_66 {dimension_numbers = #tpu.dot_dimension_numbers<[1], [0], [0], [1], [0, 0, 1, 1], [], []>} : vector<2x32xbf16>, vector<32x16xbf16>, vector<2x16xf32> -> vector<2x16xf32>
    %235 = arith.addf %234, %211 : vector<2x16xf32>
    %236 = arith.addf %235, %136 : vector<2x16xf32>
    %cst_67 = arith.constant dense<0xFF800000> : vector<2xf32>
    %237 = vector.multi_reduction <maximumf>, %236, %cst_67 [1] : vector<2x16xf32> to vector<2xf32>
    %238 = vector.shape_cast %237 : vector<2xf32> to vector<2x1xf32>
    %239 = vector.broadcast %238 : vector<2x1xf32> to vector<2x16xf32>
    %240 = arith.subf %236, %239 : vector<2x16xf32>
    %241 = math.exp %240 : vector<2x16xf32>
    %cst_68 = arith.constant dense<0.000000e+00> : vector<2xf32>
    %242 = vector.multi_reduction <add>, %241, %cst_68 [1] : vector<2x16xf32> to vector<2xf32>
    %243 = vector.shape_cast %242 : vector<2xf32> to vector<2x1xf32>
    %244 = tpu.reciprocal %243 {approx = true} : vector<2x1xf32> -> vector<2x1xf32>
    %245 = vector.broadcast %244 : vector<2x1xf32> to vector<2x16xf32>
    %246 = arith.mulf %241, %245 : vector<2x16xf32>
    %247 = vector.extract_strided_slice %148 {offsets = [16, 0], sizes = [16, 8], strides = [1, 1]} : vector<48x8xbf16> to vector<16x8xbf16>
    %248 = arith.truncf %246 : vector<2x16xf32> to vector<2x16xbf16>
    %cst_69 = arith.constant dense<0.000000e+00> : vector<2x8xf32>
    %249 = tpu.matmul %248, %247, %cst_69 {dimension_numbers = #tpu.dot_dimension_numbers<[1], [0], [0], [1], [0, 0, 1, 1], [], []>} : vector<2x16xbf16>, vector<16x8xbf16>, vector<2x8xf32> -> vector<2x8xf32>
    %250 = arith.addf %195, %249 : vector<2x8xf32>
    %cst_70 = arith.constant dense<0xFF800000> : vector<2xf32>
    %251 = vector.multi_reduction <maximumf>, %246, %cst_70 [1] : vector<2x16xf32> to vector<2xf32>
    %252 = vector.shape_cast %251 : vector<2xf32> to vector<2x1xf32>
    %253 = vector.broadcast %252 : vector<2x1xf32> to vector<2x16xf32>
    %254 = arith.cmpf oge, %246, %253 : vector<2x16xf32>
    %cst_71 = arith.constant 1.600000e+01 : f32
    %255 = vector.broadcast %cst_71 : f32 to vector<2x16xf32>
    %256 = arith.select %254, %15, %255 : vector<2x16xi1>, vector<2x16xf32>
    %cst_72 = arith.constant dense<0x7F800000> : vector<2xf32>
    %257 = vector.multi_reduction <minimumf>, %256, %cst_72 [1] : vector<2x16xf32> to vector<2xf32>
    %258 = vector.shape_cast %257 : vector<2xf32> to vector<2x1xf32>
    %259 = arith.fptosi %258 : vector<2x1xf32> to vector<2x1xi32>
    %260 = vector.broadcast %259 : vector<2x1xi32> to vector<2x16xi32>
    %261 = arith.cmpi eq, %14, %260 : vector<2x16xi32>
    %262 = arith.extui %261 : vector<2x16xi1> to vector<2x16xi32>
    %263 = arith.sitofp %262 : vector<2x16xi32> to vector<2x16xf32>
    %264 = arith.truncf %263 : vector<2x16xf32> to vector<2x16xbf16>
    %cst_73 = arith.constant dense<0.000000e+00> : vector<2x32xf32>
    %265 = tpu.matmul %264, %140, %cst_73 {dimension_numbers = #tpu.dot_dimension_numbers<[1], [0], [0], [1], [0, 0, 1, 1], [], []>} : vector<2x16xbf16>, vector<16x32xbf16>, vector<2x32xf32> -> vector<2x32xf32>
    %cst_74 = arith.constant dense<0.000000e+00> : vector<2x16xf32>
    %266 = tpu.matmul %264, %142, %cst_74 {dimension_numbers = #tpu.dot_dimension_numbers<[1], [0], [0], [1], [0, 0, 1, 1], [], []>} : vector<2x16xbf16>, vector<16x16xbf16>, vector<2x16xf32> -> vector<2x16xf32>
    %267 = vector.shape_cast %265 : vector<2x32xf32> to vector<2x1x32xf32>
    %268 = vector.broadcast %267 : vector<2x1x32xf32> to vector<2x8x32xf32>
    %269 = arith.mulf %268, %129 : vector<2x8x32xf32>
    %cst_75 = arith.constant dense<0.000000e+00> : vector<2x8xf32>
    %270 = vector.multi_reduction <add>, %269, %cst_75 [2] : vector<2x8x32xf32> to vector<2x8xf32>
    %cst_76 = arith.constant 0.176776692 : f32
    %271 = vector.broadcast %cst_76 : f32 to vector<2x8xf32>
    %272 = arith.mulf %270, %271 : vector<2x8xf32>
    %273 = arith.addf %272, %147 : vector<2x8xf32>
    %cst_77 = arith.constant dense<0xFF800000> : vector<2xf32>
    %274 = vector.multi_reduction <maximumf>, %273, %cst_77 [1] : vector<2x8xf32> to vector<2xf32>
    %275 = vector.shape_cast %274 : vector<2xf32> to vector<2x1xf32>
    %276 = vector.broadcast %275 : vector<2x1xf32> to vector<2x8xf32>
    %277 = arith.subf %273, %276 : vector<2x8xf32>
    %278 = math.exp %277 : vector<2x8xf32>
    %cst_78 = arith.constant dense<0.000000e+00> : vector<2xf32>
    %279 = vector.multi_reduction <add>, %278, %cst_78 [1] : vector<2x8xf32> to vector<2xf32>
    %280 = vector.shape_cast %279 : vector<2xf32> to vector<2x1xf32>
    %281 = tpu.reciprocal %280 {approx = true} : vector<2x1xf32> -> vector<2x1xf32>
    %282 = vector.broadcast %281 : vector<2x1xf32> to vector<2x8xf32>
    %283 = arith.mulf %278, %282 : vector<2x8xf32>
    %284 = vector.shape_cast %283 : vector<2x8xf32> to vector<2x8x1xf32>
    %285 = vector.broadcast %284 : vector<2x8x1xf32> to vector<2x8x32xf32>
    %286 = arith.mulf %285, %133 : vector<2x8x32xf32>
    %cst_79 = arith.constant dense<0.000000e+00> : vector<2x32xf32>
    %287 = vector.multi_reduction <add>, %286, %cst_79 [1] : vector<2x8x32xf32> to vector<2x32xf32>
    %288 = arith.truncf %287 : vector<2x32xf32> to vector<2x32xbf16>
    %cst_80 = arith.constant dense<0.000000e+00> : vector<2x16xf32>
    %289 = tpu.matmul %288, %125, %cst_80 {dimension_numbers = #tpu.dot_dimension_numbers<[1], [0], [0], [1], [0, 0, 1, 1], [], []>} : vector<2x32xbf16>, vector<32x16xbf16>, vector<2x16xf32> -> vector<2x16xf32>
    %290 = arith.addf %289, %266 : vector<2x16xf32>
    %291 = arith.addf %290, %136 : vector<2x16xf32>
    %cst_81 = arith.constant dense<0xFF800000> : vector<2xf32>
    %292 = vector.multi_reduction <maximumf>, %291, %cst_81 [1] : vector<2x16xf32> to vector<2xf32>
    %293 = vector.shape_cast %292 : vector<2xf32> to vector<2x1xf32>
    %294 = vector.broadcast %293 : vector<2x1xf32> to vector<2x16xf32>
    %295 = arith.subf %291, %294 : vector<2x16xf32>
    %296 = math.exp %295 : vector<2x16xf32>
    %cst_82 = arith.constant dense<0.000000e+00> : vector<2xf32>
    %297 = vector.multi_reduction <add>, %296, %cst_82 [1] : vector<2x16xf32> to vector<2xf32>
    %298 = vector.shape_cast %297 : vector<2xf32> to vector<2x1xf32>
    %299 = tpu.reciprocal %298 {approx = true} : vector<2x1xf32> -> vector<2x1xf32>
    %300 = vector.broadcast %299 : vector<2x1xf32> to vector<2x16xf32>
    %301 = arith.mulf %296, %300 : vector<2x16xf32>
    %302 = vector.extract_strided_slice %148 {offsets = [32, 0], sizes = [16, 8], strides = [1, 1]} : vector<48x8xbf16> to vector<16x8xbf16>
    %303 = arith.truncf %301 : vector<2x16xf32> to vector<2x16xbf16>
    %cst_83 = arith.constant dense<0.000000e+00> : vector<2x8xf32>
    %304 = tpu.matmul %303, %302, %cst_83 {dimension_numbers = #tpu.dot_dimension_numbers<[1], [0], [0], [1], [0, 0, 1, 1], [], []>} : vector<2x16xbf16>, vector<16x8xbf16>, vector<2x8xf32> -> vector<2x8xf32>
    %305 = arith.addf %250, %304 : vector<2x8xf32>
    %c4 = arith.constant 4 : index
    %c0_84 = arith.constant 0 : index
    %306 = vector.load %arg3[%c4, %c0_84] : memref<8x128xf32, #tpu.memory_space<vmem>>, vector<1x8xf32>
    %307 = vector.broadcast %306 : vector<1x8xf32> to vector<2x8xf32>
    %308 = arith.addf %305, %307 : vector<2x8xf32>
    %309 = vector.broadcast %5 : vector<2x1xi32> to vector<2x16xi32>
    %310 = arith.cmpi eq, %14, %309 : vector<2x16xi32>
    %311 = arith.extui %310 : vector<2x16xi1> to vector<2x16xi32>
    %312 = arith.sitofp %311 : vector<2x16xi32> to vector<2x16xf32>
    %313 = arith.truncf %312 : vector<2x16xf32> to vector<2x16xbf16>
    %cst_85 = arith.constant dense<0.000000e+00> : vector<2x32xf32>
    %314 = tpu.matmul %313, %16, %cst_85 {dimension_numbers = #tpu.dot_dimension_numbers<[1], [0], [0], [1], [0, 0, 1, 1], [], []>} : vector<2x16xbf16>, vector<16x32xbf16>, vector<2x32xf32> -> vector<2x32xf32>
    %315 = arith.addf %314, %13 : vector<2x32xf32>
    %316 = vector.shape_cast %315 : vector<2x32xf32> to vector<2x1x32xf32>
    %317 = vector.broadcast %316 : vector<2x1x32xf32> to vector<2x8x32xf32>
    %318 = arith.mulf %122, %317 : vector<2x8x32xf32>
    %cst_86 = arith.constant dense<0.000000e+00> : vector<2x8xf32>
    %319 = vector.multi_reduction <add>, %318, %cst_86 [2] : vector<2x8x32xf32> to vector<2x8xf32>
    %320 = arith.mulf %122, %122 : vector<2x8x32xf32>
    %cst_87 = arith.constant dense<0.000000e+00> : vector<2x8xf32>
    %321 = vector.multi_reduction <add>, %320, %cst_87 [2] : vector<2x8x32xf32> to vector<2x8xf32>
    %322 = arith.mulf %315, %315 : vector<2x32xf32>
    %cst_88 = arith.constant dense<0.000000e+00> : vector<2xf32>
    %323 = vector.multi_reduction <add>, %322, %cst_88 [1] : vector<2x32xf32> to vector<2xf32>
    %324 = vector.shape_cast %323 : vector<2xf32> to vector<2x1xf32>
    %325 = vector.broadcast %324 : vector<2x1xf32> to vector<2x8xf32>
    %326 = arith.mulf %321, %325 : vector<2x8xf32>
    %cst_89 = arith.constant 1.000000e-16 : f32
    %327 = vector.broadcast %cst_89 : f32 to vector<2x8xf32>
    %328 = arith.maximumf %326, %327 : vector<2x8xf32>
    %329 = math.rsqrt %328 : vector<2x8xf32>
    %330 = arith.mulf %319, %329 : vector<2x8xf32>
    %cst_90 = arith.constant 0.699999988 : f32
    %331 = vector.broadcast %cst_90 : f32 to vector<2x8xf32>
    %332 = arith.mulf %331, %330 : vector<2x8xf32>
    %cst_91 = arith.constant 3.000000e-01 : f32
    %333 = vector.broadcast %cst_91 : f32 to vector<2x8xf32>
    %334 = arith.mulf %333, %308 : vector<2x8xf32>
    %335 = arith.addf %332, %334 : vector<2x8xf32>
    %cst_92 = arith.constant -1.000000e+10 : f32
    %336 = vector.broadcast %cst_92 : f32 to vector<2x8xf32>
    %337 = arith.select %144, %335, %336 : vector<2x8xi1>, vector<2x8xf32>
    %cst_93 = arith.constant dense<0xFF800000> : vector<2xf32>
    %338 = vector.multi_reduction <maximumf>, %337, %cst_93 [1] : vector<2x8xf32> to vector<2xf32>
    %339 = vector.shape_cast %338 : vector<2xf32> to vector<2x1xf32>
    %340 = vector.broadcast %339 : vector<2x1xf32> to vector<2x8xf32>
    %341 = arith.subf %337, %340 : vector<2x8xf32>
    %342 = math.exp %341 : vector<2x8xf32>
    %cst_94 = arith.constant dense<0.000000e+00> : vector<2xf32>
    %343 = vector.multi_reduction <add>, %342, %cst_94 [1] : vector<2x8xf32> to vector<2xf32>
    %344 = vector.shape_cast %343 : vector<2xf32> to vector<2x1xf32>
    %345 = math.log %344 : vector<2x1xf32>
    %346 = vector.broadcast %345 : vector<2x1xf32> to vector<2x8xf32>
    %347 = arith.subf %341, %346 : vector<2x8xf32>
    %c0_95 = arith.constant 0 : index
    %c0_96 = arith.constant 0 : index
    %348 = vector.load %arg4[%c0_95, %c0_96] : memref<2x8xf32, #tpu.memory_space<vmem>>, vector<2x8xf32>
    tpu.vector_store %arg4[%c0_95, %c0_96], %347 {strides = array<i32>} : memref<2x8xf32, #tpu.memory_space<vmem>>, vector<2x8xf32>,
    return
  }
}

</mosaic_0001>

<bundles_post_ra>
// kernel: translator_forward.1
= control target key start
LH: loop header
LB: loop body
LE: loop exit
PB: predicated region body
PF: predicated region fallthrough
CT: control target
= control target key end

     0   :  { %9 = vsyncpa [#allocation3], 0  ;;  %s2841_s15 = smov [#allocation2]   ;;  %s3347_s0 = inlined_call_operand.vmem [shape: s32[2,15], index: 0, kind: input, shape index: {}]   ;;  %s3348_s1 = inlined_call_operand.vmem [shape: f32[2,10,32], index: 1, kind: input, shape index: {}]   ;;  %s3349_s2 = inlined_call_operand.hbm [shape: bf16[400,128], index: 2, kind: input, shape index: {}]   ;;  %s3350_s3 = inlined_call_operand.vmem [shape: f32[8,128], index: 3, kind: input, shape index: {}]   ;;  %s3351_s4 = inlined_call_operand.vmem [shape: f32[2,8], index: 4, kind: output, shape index: {}]  }
   0x1   :  { %s19_s16 = sshll.u32 %s2841_s15, 4  ;;  %s2817_s19 = scalar_lea.hbm %s3349_s2, 3200  ;;  %s20_s16 = int_to_ptr.vmem [resolvable:$true] %s19_s16 }
   0x2   :  { %p2818_p0 = scmp.ne.s32.totalorder %s3349_s2, %s2817_s19  ;;  %p2821_p1 = scmp.lt.u32.totalorder %s2817_s19, %s3349_s2 }
   0x4   :  { %p2823_p2 = pnand %p2821_p1, %p2818_p0 }
   0x6   :  { %2826 = shalt.err (!%p2823_p2)
}
   0x7   :  { %s2827_s24 = scalar_lea.vmem %s20_s16, 3200  ;;  %p2832_p4 = scmp.lt.s32.totalorder %s20_s16, %s20_s16 }
   0x8   :  { %p2828_p3 = scmp.ne.s32.totalorder %s20_s16, %s2827_s24  ;;  %p2833_p5 = scmp.lt.s32.totalorder %s2827_s24, %s2827_s24 }
   0xa   :  { %p2834_p6 = por %p2833_p5, %p2832_p4 }
   0xc   :  { %p2835_p7 = pnand %p2834_p6, %p2828_p3 }
   0xe   :  { %2838 = shalt.err (!%p2835_p7)
}
   0xf   :  { %s2842_s25 = smov 64   ;;  %s2843_s26 = smov 4  }
  0x10   :  { %25 = dma.hbm_to_vmem [thread:$0]  %s3349_s2, 3200, %s20_s16, [#allocation3], %s2842_s25, %s2842_s25, %s2843_s26  }
  0x11   :  { %2839 = dma.done.wait [#allocation3], 3200  }
  0x12   :  { %2840 = vsyncadd [#allocation3], 4294964096  ;;  %v2844_v0 = vmov 0   ;;  %v2845_v1 = vmov 0.0   ;;  %v2901_v2 = vld [vmem:[%s3347_s0] sm:$0x3]  ;;  %v37_v10 = vlaneseq }
  0x13   :  { %2733 = vset.pattern.permute.xlu0 %v2844_v0  ;;  %2508 = vmatprep.subr.bf16.mxu0 %v2845_v1  ;;  %vm400_vm0 = vcmp.eq.s32.totalorder %v2901_v2, 10  ;;  %v2742_v3 = vld [vmem:[#allocation2] sm:$0xff]   ;;  %vm2846_vm1 = vmmov 0   ;;  %v2847_v5 = vmov 8   ;;  %v2743_v7 = vld [vmem:[#allocation2 + $0x8] sm:$0xff]   ;;  %v2848_v8 = vmov 9  }
  0x14   :  { %2514 = vmatprep.subr.bf16.mxu1 %v2845_v1  ;;  %45 = vperm.xlu0 %2733, %v2901_v2   ;;  %v2378_v4 = vsel %vm400_vm0, 1.0, %v2845_v1  ;;  %v2849_v9 = vmov 10   ;;  %v2917_v11 = vand.u32 127, %v37_v10  ;;  %vm63_vm3 = vcmask 130048   ;;  %v2744_v20 = vld [vmem:[#allocation2 + $0x68] sm:$0xff]   ;;  %v2745_v25 = vld [vmem:[#allocation2 + $0x70] sm:$0xff]  }
  0x15   :  { %2509 = vmatpush3.bf16.msra.mxu0 %v2742_v3  ;;  %2510 = vmatprep.mubr.msk.bf16.mxu0 %vm2846_vm1, %v2845_v1  ;;  %v403_v6 = vsub.f32 1.0, %v2378_v4  ;;  %v2746_v26 = vld [vmem:[#allocation2 + $0x60] sm:$0xff]   ;;  %v36_v27 = vld [vmem:[%s3348_s1 + $0x18] sm:$0x3]  ;;  %v34_v29 = vld [vmem:[%s3348_s1 + $0x8] sm:$0x3] }
  0x16   :  { %2516 = vmatprep.mubr.msk.bf16.mxu1 %vm2846_vm1, %v2845_v1  ;;  %2520 = vmatprep.subr.bf16.mxu0 %v2845_v1  ;;  %v59_v28 = vrot.slane %v36_v27, 7  ;;  %vm60_vm7 = vcmask 1041409   ;;  %vm283_vm8 = vcmask 261120   ;;  %v2747_v35 = vld [vmem:[#allocation2 + $0x88] sm:$0xff]   ;;  %v2748_v41 = vld [vmem:[#allocation2 + $0x90] sm:$0xff]   ;;  %v2749_v45 = vld [vmem:[#allocation2 + $0x98] sm:$0xff]  }
  0x17   :  { %2515 = vmatpush3.bf16.msra.mxu1 %v2743_v7  ;;  %2735 = vset.pattern.permute.xlu1 %v2848_v8  ;;  %v2376_v60 = vld [vmem:[%s3350_s3 + $0x1] ss:$0 sm:$0xff]  ;;  %s2850_s10 = smov 96   ;;  %s2851_s11 = smov 32   ;;  %vm1089_vm12 = vcmp.ne.s32.totalorder %v2901_v2, 0  ;;  %vm1267_vm13 = vcmask 58368  }
  0x18   :  { %2734 = vset.pattern.permute.xlu0 %v2847_v5  ;;  %2526 = vmatprep.subr.bf16.mxu1 %v2845_v1  ;;  %v61_v30 = vsel %vm60_vm7, %v59_v28, %v34_v29  ;;  %vm1401_vm14 = vcmask 123904  }
  0x19   :  { %108 = vperm.xlu0 %2734, %v2901_v2   ;;  %164 = vperm.xlu1 %2735, %v2901_v2  }
  0x1d   :  { %406 = vperm.xlu0 %2734, %v403_v6   ;;  %2736 = vset.pattern.permute.xlu1 %v2849_v9 }
  0x1e   :  { %214 = vperm.xlu1 %2736, %v2901_v2  }
  0x21   :  { %2738 = vset.pattern.permute.xlu0 %v2844_v0 }
  0x93   :  { %v46_v12 = vpop.permute.xlu0 %45 }
  0x94   :  { %vm47_vm2 = vcmp.eq.s32.totalorder %v2917_v11, %v46_v12 }
  0x95   :  { %v2361_v13 = vsel %vm47_vm2, 1.0, %v2845_v1 }
  0x96   :  { %v50_v14 = vpack.c.bf16 %v2361_v13, %v2361_v13 }
  0x98   :  { %2511 = vmatmul.mubr.msk.bf16.vlgmr.msra.gmra.mrb[0].mxu0 %vm63_vm3, %v50_v14  ;;  %v109_v15 = vpop.permute.xlu0 %108  ;;  %v165_v18 = vpop.permute.xlu1 %164 }
  0x99   :  { %vm110_vm4 = vcmp.eq.s32.totalorder %v2917_v11, %v109_v15  ;;  %2521 = vmatpush3.bf16.msra.mxu0 %v2742_v3  ;;  %2522 = vmatprep.mubr.msk.bf16.mxu0 %vm2846_vm1, %v2845_v1  ;;  %vm166_vm5 = vcmp.eq.s32.totalorder %v2917_v11, %v165_v18 }
  0x9a   :  { %v2364_v16 = vsel %vm110_vm4, 1.0, %v2845_v1  ;;  %2532 = vmatprep.subr.bf16.mxu0 %v2845_v1  ;;  %v2367_v19 = vsel %vm166_vm5, 1.0, %v2845_v1 }
  0x9b   :  { %v113_v17 = vpack.c.bf16 %v2364_v16, %v2364_v16  ;;  %v169_v21 = vpack.c.bf16 %v2367_v19, %v2367_v19 }
  0x9d   :  { %2517 = vmatmul.mubr.msk.bf16.vlgmr.msra.gmra.mrb[0].mxu1 %vm63_vm3, %v113_v17  ;;  %v215_v22 = vpop.permute.xlu1 %214 }
  0x9e   :  { %2527 = vmatpush3.bf16.msra.mxu1 %v2743_v7  ;;  %2528 = vmatprep.mubr.msk.bf16.mxu1 %vm2846_vm1, %v2845_v1  ;;  %vm216_vm6 = vcmp.eq.s32.totalorder %v2917_v11, %v215_v22  ;;  %v2975_v22 = vshrl.u32 %v37_v10, 7  ;;  %v2752_v10 = vld [vmem:[#allocation2 + $0x10] sm:$0xff]  }
  0x9f   :  { %2540 = vmatprep.subr.bf16.mxu1 %v2845_v1  ;;  %v2369_v23 = vsel %vm216_vm6, 1.0, %v2845_v1 }
  0xa0   :  { %2523 = vmatmul.mubr.msk.bf16.vlgmr.msra.gmra.mrb[4].mxu0 %vm63_vm3, %v169_v21  ;;  %v219_v24 = vpack.c.bf16 %v2369_v23, %v2369_v23  ;;  %v2978_v23 = vsub.s32 0, %v2975_v22 }
  0xa1   :  { %2533 = vmatpush3.bf16.msra.mxu0 %v2744_v20  ;;  %2536 = vmatprep.mubr.msk.bf16.mxu0 %vm2846_vm1, %v2845_v1 }
  0xa2   :  { %2534 = vmatprep.subr.bf16.mxu0 %v2845_v1  ;;  %v661_v27 = vrot.slane %v2901_v2, %v2978_v23 }
  0xa5   :  { %2529 = vmatmul.mubr.msk.bf16.vlgmr.msra.gmra.mrb[4].mxu1 %vm63_vm3, %v219_v24  ;;  %2535 = vmatpush3.bf16.msra.mxu0 %v2745_v25  ;;  %v2750_v24 = vld [vmem:[#allocation2 + $0x78] sm:$0xff]  }
  0xa6   :  { %2542 = vmatprep.mubr.msk.bf16.mxu1 %vm2846_vm1, %v2845_v1  ;;  %2546 = vmatprep.subr.bf16.mxu0 %v2845_v1 }
  0xa7   :  { %2541 = vmatpush3.bf16.msra.mxu1 %v2746_v26  ;;  %v2751_v26 = vld [vmem:[#allocation2 + $0x80] sm:$0xff]  }
  0xa8   :  { %2554 = vmatprep.subr.bf16.mxu1 %v2845_v1 }
 0x16b   :  { %v101_v31 = vpop.f32.mrb[0].mxu0 }
 0x16c   :  { %v102_v32 = vadd.f32 %v101_v31, %v61_v30  ;;  %v2512_v33 = vpop.f32.mrb[1].mxu0  ;;  %v407_v30 = vpop.permute.xlu0 %406 }
 0x16d   :  { %v104_v34 = vpop.f32.mrb[2].mxu0 }
 0x16e   :  { %v270_v36 = vpack.c.bf16 %v102_v32, %v102_v32  ;;  %v2513_v37 = vpop.f32.mrb[3].mxu0  ;;  %v2987_v32 = vsub.s32 1, %v2975_v22 }
 0x170   :  { %v157_v38 = vpop.f32.mrb[0].mxu1  ;;  %2537 = vmatmul.mubr.msk.bf16.vlgmr.msra.gmra.mrb[8].mxu0 %vm283_vm8, %v270_v36  ;;  %v668_v34 = vrot.slane %v2901_v2, %v2987_v32 }
 0x171   :  { %v269_v39 = vpack.c.bf16 %v157_v38, %v157_v38  ;;  %v2518_v40 = vpop.f32.mrb[1].mxu1  ;;  %2547 = vmatpush3.bf16.msra.mxu0 %v2747_v35  ;;  %2550 = vmatprep.mubr.msk.bf16.mxu0 %vm2846_vm1, %v2845_v1 }
 0x172   :  { %v160_v42 = vpop.f32.mrb[2].mxu1  ;;  %2548 = vmatprep.subr.bf16.mxu0 %v2845_v1 }
 0x173   :  { %v2519_v43 = vpop.f32.mrb[3].mxu1  ;;  %2543 = vmatmul.mubr.msk.bf16.vlgmr.msra.gmra.mrb[8].mxu1 %vm63_vm3, %v269_v39  ;;  %v207_v44 = vpop.f32.mrb[4].mxu0  ;;  %v2754_v42 = vld [vmem:[#allocation2 + $0xa8] sm:$0xff]  }
 0x174   :  { %2558 = vmatprep.mubr.msk.bf16.mxu1 %vm2846_vm1, %v2845_v1  ;;  %v421_v46 = vpack.c.bf16 %v207_v44, %v207_v44  ;;  %v2524_v47 = vpop.f32.mrb[5].mxu0  ;;  %2555 = vmatpush3.bf16.msra.mxu1 %v2750_v24  ;;  %v3003_v43 = vld [vmem:[#allocation2 + $0x30] sm:$0xff]   ;;  %v3005_v44 = vld [vmem:[#allocation2 + $0x38] sm:$0xff]  }
 0x175   :  { %2549 = vmatpush3.bf16.msra.mxu0 %v2748_v41  ;;  %v210_v48 = vpop.f32.mrb[6].mxu0  ;;  %2556 = vmatprep.subr.bf16.mxu1 %v2845_v1  ;;  %v2753_v41 = vld [vmem:[#allocation2 + $0xa0] sm:$0xff]  }
 0x176   :  { %2562 = vmatprep.subr.bf16.mxu0 %v2845_v1  ;;  %v2525_v49 = vpop.f32.mrb[7].mxu0 }
 0x177   :  { %v2387_v49 = vld [vmem:[%s3350_s3 + $0x2] ss:$0 sm:$0xff] }
 0x178   :  { %2551 = vmatmul.mubr.msk.bf16.vlgmr.msra.gmra.mrb[12].mxu0 %vm283_vm8, %v421_v46  ;;  %v257_v50 = vpop.f32.mrb[4].mxu1  ;;  %2557 = vmatpush3.bf16.msra.mxu1 %v2751_v26 }
 0x179   :  { %2563 = vmatpush3.bf16.msra.mxu0 %v2749_v45  ;;  %2564 = vmatprep.mubr.msk.bf16.mxu0 %vm2846_vm1, %v2845_v1  ;;  %v2530_v51 = vpop.f32.mrb[5].mxu1  ;;  %v535_v52 = vpack.c.bf16 %v257_v50, %v257_v50  ;;  %v2852_v45 = vmov 13  }
 0x17a   :  { %2576 = vmatprep.subr.bf16.mxu0 %v2845_v1  ;;  %v260_v53 = vpop.f32.mrb[6].mxu1  ;;  %2568 = vmatprep.subr.bf16.mxu1 %v2845_v1 }
 0x17b   :  { %v2531_v54 = vpop.f32.mrb[7].mxu1  ;;  %2737 = vset.pattern.permute.xlu1 %v2852_v45 }
 0x17c   :  { %v33_v54 = vld [vmem:[%s3348_s1] sm:$0xff] }
 0x180   :  { %2565 = vmatmul.mubr.msk.bf16.vlgmr.msra.gmra.mrb[16].mxu0 %vm63_vm3, %v535_v52 }
 0x181   :  { %2578 = vmatprep.mubr.msk.bf16.mxu0 %vm2846_vm1, %v2845_v1  ;;  %2577 = vmatpush3.bf16.msra.mxu0 %v2752_v10  ;;  %v2759_v10 = vld [vmem:[#allocation2 + $0x50] sm:$0xff]  }
 0x182   :  { %2590 = vmatprep.subr.bf16.mxu0 %v2845_v1 }
 0x243   :  { %v321_v55 = vpop.f32.mrb[8].mxu0 }
 0x244   :  { %v2538_v56 = vpop.f32.mrb[9].mxu0 }
 0x245   :  { %v324_v57 = vpop.f32.mrb[10].mxu0 }
 0x246   :  { %v2539_v58 = vpop.f32.mrb[11].mxu0  ;;  %v370_v59 = vpop.f32.mrb[8].mxu1  ;;  %v35_v57 = vld [vmem:[%s3348_s1 + $0x10] sm:$0xff] }
 0x247   :  { %v371_v61 = vadd.f32 %v370_v59, %v321_v55  ;;  %v2544_v62 = vpop.f32.mrb[9].mxu1  ;;  %v2755_v58 = vld [vmem:[#allocation2 + $0x20] sm:$0xff]  }
 0x248   :  { %v373_v63 = vpop.f32.mrb[10].mxu1 }
 0x249   :  { %v381_v3 = vadd.f32 %v2376_v60, %v371_v61  ;;  %v2545_v4 = vpop.f32.mrb[11].mxu1 }
 0x24a   :  { %v2756_v4 = vld [vmem:[#allocation2 + $0x28] sm:$0xff]  }
 0x24b   :  { %2767 = vtanh.f32 %v381_v3  ;;  %v2970_v6 = vpop.f32.mrb[12].mxu0  ;;  %v2377_v16 = vmul.f32 -1.442695, %v381_v3 }
 0x24c   :  { %v2552_v7 = vpop.f32.mrb[13].mxu0 }
 0x24d   :  { %v474_v8 = vpop.f32.mrb[14].mxu0  ;;  %2769 = vpow2.f32 %v2377_v16 }
 0x24e   :  { %v2553_v9 = vpop.f32.mrb[15].mxu0 }
 0x253   :  { %v2972_v12 = vpop.f32.mrb[16].mxu0 }
 0x254   :  { %v2566_v13 = vpop.f32.mrb[17].mxu0 }
 0x255   :  { %v2768_v5 = vpop.eup %2767  ;;  %v582_v14 = vpop.f32.mrb[18].mxu0 }
 0x256   :  { %390 = vrot.lane.b32.xlu1 %v2768_v5, %s2842_s25  ;;  %v2567_v15 = vpop.f32.mrb[19].mxu0 }
 0x257   :  { %v2770_v17 = vpop.eup %2769 }
 0x258   :  { %v385_v18 = vadd.f32 1.0, %v2770_v17  ;;  %v2397_v17 = vld [vmem:[%s3350_s3] ss:$0 sm:$0xff] }
 0x25a   :  { %2771 = vrcp.f32 %v385_v18 }
 0x264   :  { %v2772_v19 = vpop.eup %2771 }
 0x2c8   :  { %v391_v20 = vpop.permute.xlu1 %390 }
 0x2c9   :  { %v393_v21 = vmul.f32 %v2772_v19, %v391_v20 }
 0x2cb   :  { %2773 = vtanh.f32 %v393_v21 }
 0x2d5   :  { %v2774_v25 = vpop.eup %2773 }
 0x2d6   :  { %396 = vrot.lane.b32.xlu1 %v2774_v25, %s2850_s10 }
 0x2da   :  { %663 = vbcast.lane.b32.xlu1 %v661_v27, 256 }
 0x2de   :  { %878 = vrot.lane.b32.xlu1 %v3003_v43, %s2842_s25 }
 0x2e2   :  { %1098 = vperm.xlu1 %2737, %v2901_v2  }
 0x2e6   :  { %830 = vrot.lane.b32.xlu1 %v3005_v44, %s2850_s10 }
 0x2e7   :  { %2739 = vset.pattern.permute.xlu1 %v2844_v0 }
 0x348   :  { %v397_v28 = vpop.permute.xlu1 %396 }
 0x349   :  { %v399_v29 = vmul.f32 %v2772_v19, %v397_v28 }
 0x34b   :  { %v409_v31 = vmul.f32 %v407_v30, %v399_v29  ;;  %v2388_v29 = vld [vmem:[%s3350_s3 + $0x3] ss:$0 sm:$0xff]  ;;  %v2760_v30 = vld [vmem:[#allocation2 + $0x58] sm:$0xff]  }
 0x34c   :  { %v664_v35 = vpop.permute.xlu1 %663 }
 0x34d   :  { %v420_v33 = vpack.c.bf16 %v409_v31, %v409_v31  ;;  %vm672_vm9 = vcmp.eq.s32.totalorder %v2917_v11, %v664_v35 }
 0x34e   :  { %v2392_v37 = vsel %vm672_vm9, 1.0, %v2845_v1 }
 0x34f   :  { %478 = vrot.lane.b32.xlu0 %v420_v33, %s2851_s11  ;;  %v2761_v33 = vld [vmem:[#allocation2 + $0x18] sm:$0xff]  }
 0x353   :  { %670 = vbcast.lane.b32.xlu0 %v668_v34, 256  ;;  %v3064_v34 = vld [vmem:[#allocation2 + $0x40] sm:$0xff]  }
 0x357   :  { %880 = vrot.lane.b32.xlu0 %v3005_v44, %s2842_s25 }
 0x35b   :  { %828 = vrot.lane.b32.xlu0 %v3003_v43, %s2850_s10 }
 0x3c1   :  { %v479_v36 = vpop.permute.xlu0 %478 }
 0x3c2   :  { %2559 = vmatmul.mubr.msk.bf16.vlgmr.msra.gmra.mrb[12].mxu1 %vm283_vm8, %v479_v36  ;;  %v3071_v36 = vld [vmem:[#allocation2 + $0x48] sm:$0xff]  }
 0x3c3   :  { %2572 = vmatprep.mubr.msk.bf16.mxu1 %vm2846_vm1, %v2845_v1  ;;  %2569 = vmatpush3.bf16.msra.mxu1 %v2753_v41 }
 0x3c4   :  { %2570 = vmatprep.subr.bf16.mxu1 %v2845_v1 }
 0x3c5   :  { %v671_v38 = vpop.permute.xlu0 %670 }
 0x3c6   :  { %vm673_vm10 = vcmp.eq.s32.totalorder %v2917_v11, %v671_v38 }
 0x3c7   :  { %v2393_v39 = vsel %vm673_vm10, 1.0, %v2845_v1  ;;  %2571 = vmatpush3.bf16.msra.mxu1 %v2754_v42 }
 0x3c8   :  { %v2434_v40 = vpack.c.bf16 %v2393_v39, %v2392_v37  ;;  %2582 = vmatprep.subr.bf16.mxu1 %v2845_v1 }
 0x3c9   :  { %v881_v7 = vpop.permute.xlu0 %880 }
 0x3ca   :  { %2579 = vmatmul.mubr.msk.bf16.vlgmr.msra.gmra.mrb[20].mxu0 %vm63_vm3, %v2434_v40 }
 0x3cb   :  { %2594 = vmatprep.mubr.msk.bf16.mxu0 %vm2846_vm1, %v2845_v1 }
 0x3cd   :  { %v829_v9 = vpop.permute.xlu0 %828 }
 0x3ce   :  { %2591 = vmatpush3.bf16.msra.mxu0 %v829_v9 }
 0x3cf   :  { %2592 = vmatprep.subr.bf16.mxu0 %v2845_v1 }
 0x495   :  { %v529_v46 = vpop.f32.mrb[12].mxu1 }
 0x496   :  { %v530_v47 = vadd.f32 %v529_v46, %v2970_v6  ;;  %v2560_v48 = vpop.f32.mrb[13].mxu1  ;;  %v879_v6 = vpop.permute.xlu1 %878 }
 0x497   :  { %v532_v50 = vpop.f32.mrb[14].mxu1 }
 0x498   :  { %v585_v51 = vadd.f32 %v2972_v12, %v530_v47  ;;  %v2561_v52 = vpop.f32.mrb[15].mxu1 }
 0x49a   :  { %v591_v53 = vadd.f32 %v2387_v49, %v585_v51  ;;  %v3037_v8 = vpop.permute.xlu1 %1098 }
 0x49b   :  { %vm1100_vm11 = vcmp.eq.s32.totalorder %v2917_v11, %v3037_v8 }
 0x49c   :  { %v592_v55 = vmax.f32 %v591_v53, 0.0  ;;  %v2413_v47 = vsel %vm1100_vm11, 1.0, %v2845_v1 }
 0x49d   :  { %v730_v56 = vpop.f32.mrb[20].mxu0 }
 0x49e   :  { %v597_v59 = vpack.c.bf16 %v592_v55, %v592_v55  ;;  %v731_v60 = vadd.f32 %v730_v56, %v33_v54  ;;  %v2580_v61 = vpop.f32.mrb[21].mxu0  ;;  %v831_v12 = vpop.permute.xlu1 %830  ;;  %v1103_v55 = vpack.c.bf16 %v2413_v47, %v2413_v47  ;;  %v3143_v47 = vsub.s32 %v2917_v11, %v2975_v22 }
 0x49f   :  { %v733_v62 = vpop.f32.mrb[22].mxu0  ;;  %2593 = vmatpush3.bf16.msra.mxu0 %v831_v12  ;;  %v2853_v61 = vmov 1966171168  }
 0x4a0   :  { %2573 = vmatmul.mubr.msk.bf16.vlgmr.msra.gmra.mrb[16].mxu1 %vm283_vm8, %v597_v59  ;;  %v734_v63 = vadd.f32 %v733_v62, %v35_v57  ;;  %v2581_v3 = vpop.f32.mrb[23].mxu0  ;;  %2606 = vmatprep.subr.bf16.mxu0 %v2845_v1  ;;  %v1189_v62 = vunpack.c.l.s4 %v2853_v61 }
 0x4a1   :  { %2583 = vmatpush3.bf16.msra.mxu1 %v2755_v58  ;;  %2586 = vmatprep.mubr.msk.bf16.mxu1 %vm2846_vm1, %v2845_v1 }
 0x4a2   :  { %v741_v5 = vpack.c.bf16 %v734_v63, %v731_v60  ;;  %2584 = vmatprep.subr.bf16.mxu1 %v2845_v1  ;;  %v1190_v63 = vunpack.c.0.s8 %v1189_v62 }
 0x4a4   :  { %v3117_v3 = vsub.s32 %v1190_v63, %v2975_v22 }
 0x4a5   :  { %2585 = vmatpush3.bf16.msra.mxu1 %v2756_v4 }
 0x4a6   :  { %2598 = vmatprep.subr.bf16.mxu1 %v2845_v1 }
 0x4a8   :  { %2587 = vmatmul.mubr.msk.bf16.vlgmr.msra.gmra.mrb[20].mxu1 %vm283_vm8, %v741_v5 }
 0x4a9   :  { %2602 = vmatprep.mubr.msk.bf16.mxu1 %vm2846_vm1, %v2845_v1  ;;  %2599 = vmatpush3.bf16.msra.mxu1 %v879_v6 }
 0x4aa   :  { %2600 = vmatprep.subr.bf16.mxu1 %v2845_v1 }
 0x4ad   :  { %2601 = vmatpush3.bf16.msra.mxu1 %v881_v7 }
 0x4ae   :  { %2614 = vmatprep.subr.bf16.mxu1 %v2845_v1 }
 0x573   :  { %v652_v13 = vpop.f32.mrb[16].mxu1 }
 0x574   :  { %v2574_v14 = vpop.f32.mrb[17].mxu1  ;;  %v653_v31 = vadd.f32 %v2388_v29, %v652_v13 }
 0x575   :  { %v655_v15 = vpop.f32.mrb[18].mxu1 }
 0x576   :  { %v2575_v16 = vpop.f32.mrb[19].mxu1  ;;  %v925_v35 = vpack.c.bf16 %v653_v31, %v653_v31 }
 0x57b   :  { %v796_v18 = vpop.f32.mrb[20].mxu1 }
 0x57c   :  { %v797_v19 = vadd.f32 %v2397_v17, %v796_v18  ;;  %v2588_v20 = vpop.f32.mrb[21].mxu1 }
 0x57d   :  { %v799_v21 = vpop.f32.mrb[22].mxu1 }
 0x57e   :  { %v800_v24 = vadd.f32 %v2397_v17, %v799_v21  ;;  %v2589_v25 = vpop.f32.mrb[23].mxu1  ;;  %v3045_v26 = vmax.f32 %v797_v19, 0.0 }
 0x580   :  { %v3047_v27 = vmax.f32 %v800_v24, 0.0 }
 0x582   :  { %v817_v28 = vpack.c.bf16 %v3047_v27, %v3045_v26 }
 0x584   :  { %2595 = vmatmul.mubr.msk.bf16.vlgmr.msra.gmra.mrb[24].mxu0 %vm283_vm8, %v817_v28  ;;  %2603 = vmatmul.mubr.msk.bf16.vlgmr.msra.gmra.mrb[24].mxu1 %vm283_vm8, %v817_v28 }
 0x585   :  { %2607 = vmatpush3.bf16.msra.mxu0 %v2759_v10  ;;  %2615 = vmatpush3.bf16.msra.mxu1 %v3003_v43  ;;  %v2854_v10 = vmov -1e+09  }
 0x586   :  { %2608 = vmatprep.subr.bf16.mxu0 %v2845_v1  ;;  %2616 = vmatprep.subr.bf16.mxu1 %v2845_v1  ;;  %v1090_v28 = vsel %vm1089_vm12, 0.0, %v2854_v10 }
 0x587   :  { %2610 = vmatprep.mubr.msk.bf16.mxu0 %vm2846_vm1, %v2845_v1  ;;  %2618 = vmatprep.mubr.msk.bf16.mxu1 %vm2846_vm1, %v2845_v1  ;;  %v1241_v29 = vrot.slane %v1090_v28, %v2987_v32 }
 0x589   :  { %2609 = vmatpush3.bf16.msra.mxu0 %v2760_v30  ;;  %2617 = vmatpush3.bf16.msra.mxu1 %v3005_v44  ;;  %v1234_v30 = vrot.slane %v1090_v28, %v2978_v23 }
 0x58a   :  { %2622 = vmatprep.subr.bf16.mxu0 %v2845_v1  ;;  %2630 = vmatprep.subr.bf16.mxu1 %v2845_v1 }
 0x58c   :  { %2611 = vmatmul.mubr.msk.bf16.vlgmr.msra.gmra.mrb[28].mxu0 %vm283_vm8, %v925_v35  ;;  %2619 = vmatmul.mubr.msk.bf16.vlgmr.msra.gmra.mrb[28].mxu1 %vm283_vm8, %v2761_v33 }
 0x58d   :  { %2623 = vmatpush3.bf16.msra.mxu0 %v3064_v34  ;;  %2626 = vmatprep.mubr.msk.bf16.mxu0 %vm2846_vm1, %v2845_v1 }
 0x58e   :  { %2624 = vmatprep.subr.bf16.mxu0 %v2845_v1  ;;  %2632 = vmatprep.mubr.msk.bf16.mxu1 %vm2846_vm1, %v2845_v1 }
 0x591   :  { %2625 = vmatpush3.bf16.msra.mxu0 %v3071_v36 }
 0x592   :  { %2636 = vmatprep.subr.bf16.mxu0 %v2845_v1 }
 0x594   :  { %2627 = vmatmul.mubr.msk.bf16.vlgmr.msra.gmra.mrb[32].mxu0 %vm283_vm8, %v2761_v33 }
 0x595   :  { %2638 = vmatprep.mubr.msk.bf16.mxu0 %vm2846_vm1, %v2845_v1 }
 0x657   :  { %v3083_v37 = vpop.f32.mrb[24].mxu0  ;;  %v3085_v38 = vpop.f32.mrb[24].mxu1 }
 0x658   :  { %v2596_v39 = vpop.f32.mrb[25].mxu0  ;;  %v2604_v40 = vpop.f32.mrb[25].mxu1 }
 0x659   :  { %v3087_v41 = vpop.f32.mrb[26].mxu0  ;;  %v3089_v42 = vpop.f32.mrb[26].mxu1 }
 0x65a   :  { %v2597_v43 = vpop.f32.mrb[27].mxu0  ;;  %v2605_v44 = vpop.f32.mrb[27].mxu1 }
 0x65f   :  { %v3093_v45 = vpop.f32.mrb[28].mxu0  ;;  %v1027_v46 = vpop.f32.mrb[28].mxu1 }
 0x660   :  { %v2612_v48 = vpop.f32.mrb[29].mxu0  ;;  %v2620_v49 = vpop.f32.mrb[29].mxu1 }
 0x661   :  { %v978_v50 = vpop.f32.mrb[30].mxu0  ;;  %v1030_v51 = vpop.f32.mrb[30].mxu1 }
 0x662   :  { %v3096_v52 = vpack.c.bf16 %v1030_v51, %v1027_v46  ;;  %v2613_v53 = vpop.f32.mrb[31].mxu0  ;;  %v2621_v54 = vpop.f32.mrb[31].mxu1 }
 0x664   :  { %2631 = vmatpush3.bf16.msra.mxu1 %v3096_v52 }
 0x665   :  { %2642 = vmatprep.subr.bf16.mxu1 %v2845_v1 }
 0x667   :  { %v1081_v56 = vpop.f32.mrb[32].mxu0  ;;  %2633 = vmatmul.mubr.msk.bf16.vlgmr.msra.gmra.mrb[32].mxu1 %vm63_vm3, %v1103_v55 }
 0x668   :  { %v2628_v57 = vpop.f32.mrb[33].mxu0  ;;  %2643 = vmatpush3.bf16.msra.mxu1 %v3064_v34  ;;  %2646 = vmatprep.mubr.msk.bf16.mxu1 %vm2846_vm1, %v2845_v1 }
 0x669   :  { %v1084_v58 = vpop.f32.mrb[34].mxu0  ;;  %2644 = vmatprep.subr.bf16.mxu1 %v2845_v1 }
 0x66a   :  { %v3105_v59 = vpack.c.bf16 %v1084_v58, %v1081_v56  ;;  %v2629_v60 = vpop.f32.mrb[35].mxu0 }
 0x66c   :  { %2637 = vmatpush3.bf16.msra.mxu0 %v3105_v59  ;;  %2645 = vmatpush3.bf16.msra.mxu1 %v3071_v36 }
 0x66d   :  { %2650 = vmatprep.subr.bf16.mxu0 %v2845_v1  ;;  %2656 = vmatprep.subr.bf16.mxu1 %v2845_v1 }
 0x66f   :  { %2639 = vmatmul.mubr.msk.bf16.vlgmr.msra.gmra.mrb[36].mxu0 %vm63_vm3, %v1103_v55 }
 0x670   :  { %2651 = vmatpush3.bf16.msra.mxu0 %v3096_v52  ;;  %2652 = vmatprep.mubr.msk.bf16.mxu0 %vm2846_vm1, %v2845_v1 }
 0x671   :  { %2662 = vmatprep.subr.bf16.mxu0 %v2845_v1 }
 0x73a   :  { %v1141_v4 = vpop.f32.mrb[32].mxu1 }
 0x73b   :  { %v1194_v5 = vrot.slane %v1141_v4, %v3117_v3  ;;  %v2634_v6 = vpop.f32.mrb[33].mxu1 }
 0x73c   :  { %v1144_v7 = vpop.f32.mrb[34].mxu1 }
 0x73d   :  { %v1195_v8 = vcombine.high %v1194_v5, %v1194_v5  ;;  %v1202_v9 = vrot.slane %v1194_v5, %v3117_v3  ;;  %v2635_v12 = vpop.f32.mrb[35].mxu1 }
 0x73f   :  { %v1209_v13 = vrot.slane %v1195_v8, %v3117_v3  ;;  %v1213_v14 = vrot.slane %v1202_v9, %v2978_v23 }
 0x741   :  { %v1220_v15 = vmul.f32 %v1213_v14, %v3083_v37  ;;  %v1217_v16 = vrot.slane %v1209_v13, %v2978_v23 }
 0x742   :  { %v3125_v17 = vpop.f32.mrb[36].mxu0 }
 0x743   :  { %v2640_v18 = vpop.f32.mrb[37].mxu0  ;;  %v1222_v19 = vsel %vm283_vm8, %v1220_v15, 0.0  ;;  %v1221_v20 = vmul.f32 %v1217_v16, %v3087_v41 }
 0x744   :  { %1223 = vadd.xlane.f32.xlu0 %v1222_v19  ;;  %v1184_v21 = vpop.f32.mrb[38].mxu0 }
 0x745   :  { %v2641_v24 = vpop.f32.mrb[39].mxu0  ;;  %v1225_v25 = vsel %vm283_vm8, %v1221_v20, 0.0 }
 0x746   :  { %1226 = vadd.xlane.f32.xlu1 %v1225_v25 }
 0x757   :  { %1243 = vbcast.lane.b32.xlu1 %v1241_v29, 256 }
 0x75a   :  { %1236 = vbcast.lane.b32.xlu0 %v1234_v30, 256 }
 0x7d1   :  { %v1224_v31 = vpop.xlane.xlu0 %1223 }
 0x7d2   :  { %v1228_v35 = vmul.f32 0.17677669, %v1224_v31 }
 0x7d3   :  { %v1227_v33 = vpop.xlane.xlu1 %1226 }
 0x7d4   :  { %v1229_v40 = vmul.f32 0.17677669, %v1227_v33 }
 0x7d5   :  { %v3135_v39 = vpop.permute.xlu0 %1236 }
 0x7d6   :  { %v1247_v43 = vadd.f32 %v3135_v39, %v1228_v35 }
 0x7d7   :  { %v3138_v44 = vpop.permute.xlu1 %1243 }
 0x7d8   :  { %v1248_v46 = vadd.f32 %v3138_v44, %v1229_v40  ;;  %1252 = vperm.xlu0 %2738, %v1247_v43  }
 0x7da   :  { %1255 = vperm.xlu1 %2739, %v1248_v46  }
 0x857   :  { %v1253_v48 = vpop.permute.xlu0 %1252 }
 0x858   :  { %v1260_v50 = vrot.slane %v1253_v48, %v3143_v47 }
 0x859   :  { %v1256_v49 = vpop.permute.xlu1 %1255 }
 0x85a   :  { %v1264_v51 = vrot.slane %v1256_v49, %v3143_v47 }
 0x85c   :  { %v1265_v53 = vsel %vm60_vm7, %v1264_v51, %v1260_v50 }
 0x85d   :  { %v1268_v54 = vsel %vm1267_vm13, %v1265_v53, -inf }
 0x85e   :  { %1269 = vmax.xlane.f32.xlu1 %v1268_v54 }
 0x8eb   :  { %v1270_v55 = vpop.xlane.xlu1 %1269 }
 0x8ec   :  { %v1275_v56 = vrot.slane %v1270_v55, %v2978_v23  ;;  %v1279_v57 = vrot.slane %v1270_v55, %v2987_v32 }
 0x8ee   :  { %v1282_v58 = vsub.f32 %v1247_v43, %v1275_v56  ;;  %v1283_v22 = vsub.f32 %v1248_v46, %v1279_v57 }
 0x8f0   :  { %v1284_v60 = vmul.f32 1.442695, %v1282_v58  ;;  %v1286_v61 = vmul.f32 1.442695, %v1283_v22 }
 0x8f2   :  { %2775 = vpow2.f32 %v1284_v60 }
 0x8f3   :  { %2777 = vpow2.f32 %v1286_v61 }
 0x8fc   :  { %v2776_v62 = vpop.eup %2775 }
 0x8fd   :  { %1291 = vperm.xlu0 %2738, %v2776_v62   ;;  %v2778_v63 = vpop.eup %2777 }
 0x901   :  { %1294 = vperm.xlu0 %2738, %v2778_v63  }
 0x97c   :  { %v1292_v4 = vpop.permute.xlu0 %1291 }
 0x97d   :  { %v1299_v6 = vrot.slane %v1292_v4, %v3143_v47 }
 0x980   :  { %v1295_v5 = vpop.permute.xlu0 %1294 }
 0x981   :  { %v1303_v7 = vrot.slane %v1295_v5, %v3143_v47 }
 0x983   :  { %v1304_v8 = vsel %vm60_vm7, %v1303_v7, %v1299_v6 }
 0x984   :  { %v1306_v9 = vsel %vm1267_vm13, %v1304_v8, 0.0 }
 0x985   :  { %1307 = vadd.xlane.f32.xlu0 %v1306_v9 }
 0xa12   :  { %v1308_v12 = vpop.xlane.xlu0 %1307 }
 0xa13   :  { %2779 = vrcp.f32 %v1308_v12 }
 0xa1d   :  { %v2780_v13 = vpop.eup %2779 }
 0xa1e   :  { %v1318_v14 = vrot.slane %v2780_v13, %v2987_v32  ;;  %v1314_v15 = vrot.slane %v2780_v13, %v2978_v23 }
 0xa20   :  { %v1322_v16 = vmul.f32 %v2778_v63, %v1318_v14  ;;  %v1321_v18 = vmul.f32 %v2776_v62, %v1314_v15  ;;  %v39_v15 = vcvt.s32.f32 %v2917_v11 }
 0xa22   :  { %1330 = vperm.xlu0 %2738, %v1322_v16   ;;  %1325 = vperm.xlu1 %2739, %v1321_v18  }
 0xaa1   :  { %v1331_v19 = vpop.permute.xlu0 %1330  ;;  %v1326_v20 = vpop.permute.xlu1 %1325 }
 0xaa2   :  { %v1334_v21 = vmul.f32 %v1331_v19, %v3089_v42  ;;  %v1333_v24 = vmul.f32 %v1326_v20, %v3085_v38 }
 0xaa4   :  { %v1342_v25 = vsel %vm283_vm8, %v1334_v21, 0.0  ;;  %v1335_v10 = vsel %vm283_vm8, %v1333_v24, 0.0 }
 0xaa5   :  { %v1343_v28 = vrot.slane %v1342_v25, 4  ;;  %v1336_v29 = vrot.slane %v1335_v10, 4 }
 0xaa7   :  { %v1344_v30 = vadd.f32 %v1343_v28, %v1342_v25  ;;  %v1337_v31 = vadd.f32 %v1336_v29, %v1335_v10 }
 0xaa9   :  { %v1345_v33 = vrot.slane %v1344_v30, 2  ;;  %v1338_v35 = vrot.slane %v1337_v31, 2 }
 0xaab   :  { %v1346_v40 = vadd.f32 %v1345_v33, %v1344_v30  ;;  %v1339_v43 = vadd.f32 %v1338_v35, %v1337_v31 }
 0xaad   :  { %v1347_v46 = vrot.slane %v1346_v40, 1  ;;  %v1340_v48 = vrot.slane %v1339_v43, 1 }
 0xaaf   :  { %v1348_v49 = vadd.f32 %v1347_v46, %v1346_v40  ;;  %v1341_v50 = vadd.f32 %v1340_v48, %v1339_v43 }
 0xab1   :  { %v1350_v51 = vpack.c.bf16 %v1348_v49, %v1348_v49  ;;  %v1349_v53 = vpack.c.bf16 %v1341_v50, %v1341_v50 }
 0xab3   :  { %v1354_v54 = vunpack.c.l.b16 %v1350_v51  ;;  %v1353_v55 = vunpack.c.l.b16 %v1349_v53 }
 0xab5   :  { %v1355_v56 = vsel %vm60_vm7, %v1354_v54, %v1353_v55 }
 0xab6   :  { %v1356_v57 = vpack.c.b16 %v1355_v56, %v1355_v56 }
 0xab8   :  { %2647 = vmatmul.mubr.msk.bf16.vlgmr.msra.gmra.mrb[36].mxu1 %vm283_vm8, %v1356_v57 }
 0xab9   :  { %2657 = vmatpush3.bf16.msra.mxu1 %v3105_v59  ;;  %2658 = vmatprep.mubr.msk.bf16.mxu1 %vm2846_vm1, %v2845_v1 }
 0xaba   :  { %2670 = vmatprep.subr.bf16.mxu1 %v2845_v1 }
 0xb8b   :  { %v1394_v58 = vpop.f32.mrb[36].mxu1 }
 0xb8c   :  { %v1395_v22 = vadd.f32 %v1394_v58, %v3125_v17  ;;  %v2648_v60 = vpop.f32.mrb[37].mxu1 }
 0xb8d   :  { %v1397_v61 = vpop.f32.mrb[38].mxu1 }
 0xb8e   :  { %v2649_v62 = vpop.f32.mrb[39].mxu1  ;;  %v1400_v63 = vadd.f32 %v1395_v22, %v3093_v45 }
 0xb90   :  { %v1402_v4 = vsel %vm1401_vm14, %v1400_v63, -inf }
 0xb91   :  { %1403 = vmax.xlane.f32.xlu1 %v1402_v4 }
 0xc1e   :  { %v1404_v5 = vpop.xlane.xlu1 %1403 }
 0xc1f   :  { %v1405_v6 = vsub.f32 %v1400_v63, %v1404_v5 }
 0xc21   :  { %v1406_v7 = vmul.f32 1.442695, %v1405_v6 }
 0xc23   :  { %2781 = vpow2.f32 %v1406_v7 }
 0xc2d   :  { %v2782_v8 = vpop.eup %2781 }
 0xc2e   :  { %v1408_v9 = vsel %vm1401_vm14, %v2782_v8, 0.0 }
 0xc2f   :  { %1409 = vadd.xlane.f32.xlu0 %v1408_v9 }
 0xcbc   :  { %v1410_v12 = vpop.xlane.xlu0 %1409 }
 0xcbd   :  { %2783 = vrcp.f32 %v1410_v12 }
 0xcc7   :  { %v2784_v17 = vpop.eup %2783 }
 0xcc8   :  { %v3171_v13 = vmul.f32 %v2784_v17, %v2782_v8 }
 0xcca   :  { %v1414_v14 = vsel %vm1401_vm14, %v3171_v13, -inf }
 0xccb   :  { %1415 = vmax.xlane.f32.xlu1 %v1414_v14 }
 0xd58   :  { %v1416_v16 = vpop.xlane.xlu1 %1415 }
 0xd59   :  { %vm1417_vm15 = vcmp.ge.f32.partialorder %v3171_v13, %v1416_v16 }
 0xd5a   :  { %v1418_v18 = vsel %vm1417_vm15, %v39_v15, 16.0 }
 0xd5b   :  { %v1419_v19 = vsel %vm1401_vm14, %v1418_v18, inf }
 0xd5c   :  { %1420 = vmin.xlane.f32.xlu1 %v1419_v19 }
 0xde9   :  { %v1421_v20 = vpop.xlane.xlu1 %1420 }
 0xdea   :  { %v2714_v21 = vtrunc.f32 %v1421_v20 }
 0xdec   :  { %v2715_v24 = vcvt.f32.s32 %v2714_v21 }
 0xdee   :  { %vm1423_vm0 = vcmp.eq.s32.totalorder %v2917_v11, %v2715_v24 }
 0xdef   :  { %v2417_v25 = vsel %vm1423_vm0, 1.0, %v2845_v1 }
 0xdf0   :  { %v1426_v10 = vpack.c.bf16 %v2417_v25, %v2417_v25 }
 0xdf2   :  { %2653 = vmatmul.mubr.msk.bf16.vlgmr.msra.gmra.mrb[40].mxu0 %vm63_vm3, %v1426_v10  ;;  %2659 = vmatmul.mubr.msk.bf16.vlgmr.msra.gmra.mrb[40].mxu1 %vm63_vm3, %v1426_v10 }
 0xdf3   :  { %2663 = vmatpush3.bf16.msra.mxu0 %v3064_v34  ;;  %2666 = vmatprep.mubr.msk.bf16.mxu0 %vm2846_vm1, %v2845_v1 }
 0xdf4   :  { %2664 = vmatprep.subr.bf16.mxu0 %v2845_v1  ;;  %2672 = vmatprep.mubr.msk.bf16.mxu1 %vm2846_vm1, %v2845_v1 }
 0xdf7   :  { %2665 = vmatpush3.bf16.msra.mxu0 %v3071_v36 }
 0xdf8   :  { %2676 = vmatprep.subr.bf16.mxu0 %v2845_v1 }
 0xec5   :  { %v1464_v28 = vpop.f32.mrb[40].mxu0  ;;  %v3192_v29 = vpop.f32.mrb[40].mxu1 }
 0xec6   :  { %v1517_v30 = vrot.slane %v1464_v28, %v3117_v3  ;;  %v2654_v31 = vpop.f32.mrb[41].mxu0  ;;  %v2660_v33 = vpop.f32.mrb[41].mxu1 }
 0xec7   :  { %v1467_v35 = vpop.f32.mrb[42].mxu0  ;;  %v1507_v40 = vpop.f32.mrb[42].mxu1 }
 0xec8   :  { %v1518_v43 = vcombine.high %v1517_v30, %v1517_v30  ;;  %v1525_v46 = vrot.slane %v1517_v30, %v3117_v3  ;;  %v2655_v48 = vpop.f32.mrb[43].mxu0  ;;  %v2661_v49 = vpop.f32.mrb[43].mxu1 }
 0xeca   :  { %v1532_v50 = vrot.slane %v1518_v43, %v3117_v3  ;;  %v1536_v51 = vrot.slane %v1525_v46, %v2978_v23 }
 0xecc   :  { %v1543_v53 = vmul.f32 %v1536_v51, %v3083_v37  ;;  %v1540_v54 = vrot.slane %v1532_v50, %v2978_v23 }
 0xece   :  { %v1545_v55 = vsel %vm283_vm8, %v1543_v53, 0.0  ;;  %v1544_v56 = vmul.f32 %v1540_v54, %v3087_v41 }
 0xecf   :  { %1546 = vadd.xlane.f32.xlu0 %v1545_v55 }
 0xed0   :  { %v1548_v57 = vsel %vm283_vm8, %v1544_v56, 0.0 }
 0xed1   :  { %1549 = vadd.xlane.f32.xlu1 %v1548_v57 }
 0xf5c   :  { %v1547_v58 = vpop.xlane.xlu0 %1546 }
 0xf5d   :  { %v1551_v22 = vmul.f32 0.17677669, %v1547_v58 }
 0xf5e   :  { %v1550_v60 = vpop.xlane.xlu1 %1549 }
 0xf5f   :  { %v1553_v61 = vadd.f32 %v1551_v22, %v3135_v39  ;;  %v1552_v62 = vmul.f32 0.17677669, %v1550_v60 }
 0xf61   :  { %v1554_v63 = vadd.f32 %v1552_v62, %v3138_v44  ;;  %1558 = vperm.xlu0 %2738, %v1553_v61  }
 0xf63   :  { %1561 = vperm.xlu1 %2739, %v1554_v63  }
 0xfe0   :  { %v1559_v4 = vpop.permute.xlu0 %1558 }
 0xfe1   :  { %v1566_v6 = vrot.slane %v1559_v4, %v3143_v47 }
 0xfe2   :  { %v1562_v5 = vpop.permute.xlu1 %1561 }
 0xfe3   :  { %v1570_v7 = vrot.slane %v1562_v5, %v3143_v47 }
 0xfe5   :  { %v1571_v8 = vsel %vm60_vm7, %v1570_v7, %v1566_v6 }
 0xfe6   :  { %v1573_v9 = vsel %vm1267_vm13, %v1571_v8, -inf }
 0xfe7   :  { %1574 = vmax.xlane.f32.xlu1 %v1573_v9 }
0x1074   :  { %v1575_v12 = vpop.xlane.xlu1 %1574 }
0x1075   :  { %v1580_v17 = vrot.slane %v1575_v12, %v2978_v23  ;;  %v1584_v14 = vrot.slane %v1575_v12, %v2987_v32 }
0x1077   :  { %v1587_v16 = vsub.f32 %v1553_v61, %v1580_v17  ;;  %v1588_v18 = vsub.f32 %v1554_v63, %v1584_v14 }
0x1079   :  { %v1589_v19 = vmul.f32 1.442695, %v1587_v16  ;;  %v1591_v20 = vmul.f32 1.442695, %v1588_v18  ;;  %v2764_v18 = vld [vmem:[#allocation2 + $0xb0] sm:$0xff]  }
0x107b   :  { %2785 = vpow2.f32 %v1589_v19 }
0x107c   :  { %2787 = vpow2.f32 %v1591_v20  ;;  %v1413_v20 = vpack.c.bf16 %v3171_v13, %v3171_v13 }
0x1085   :  { %v2786_v21 = vpop.eup %2785 }
0x1086   :  { %1596 = vperm.xlu0 %2738, %v2786_v21   ;;  %v2788_v24 = vpop.eup %2787 }
0x108a   :  { %1599 = vperm.xlu0 %2738, %v2788_v24  }
0x1105   :  { %v1597_v25 = vpop.permute.xlu0 %1596 }
0x1106   :  { %v1604_v28 = vrot.slane %v1597_v25, %v3143_v47 }
0x1109   :  { %v1600_v10 = vpop.permute.xlu0 %1599 }
0x110a   :  { %v1608_v30 = vrot.slane %v1600_v10, %v3143_v47 }
0x110c   :  { %v1609_v31 = vsel %vm60_vm7, %v1608_v30, %v1604_v28 }
0x110d   :  { %v1611_v33 = vsel %vm1267_vm13, %v1609_v31, 0.0 }
0x110e   :  { %1612 = vadd.xlane.f32.xlu0 %v1611_v33 }
0x119b   :  { %v1613_v35 = vpop.xlane.xlu0 %1612 }
0x119c   :  { %2789 = vrcp.f32 %v1613_v35 }
0x11a6   :  { %v2790_v40 = vpop.eup %2789 }
0x11a7   :  { %v1623_v43 = vrot.slane %v2790_v40, %v2987_v32  ;;  %v1619_v46 = vrot.slane %v2790_v40, %v2978_v23 }
0x11a9   :  { %v1627_v48 = vmul.f32 %v2788_v24, %v1623_v43  ;;  %v1626_v49 = vmul.f32 %v2786_v21, %v1619_v46 }
0x11ab   :  { %1635 = vperm.xlu0 %2738, %v1627_v48   ;;  %1630 = vperm.xlu1 %2739, %v1626_v49  }
0x122a   :  { %v1636_v50 = vpop.permute.xlu0 %1635  ;;  %v1631_v51 = vpop.permute.xlu1 %1630 }
0x122b   :  { %v1639_v53 = vmul.f32 %v1636_v50, %v3089_v42  ;;  %v1638_v54 = vmul.f32 %v1631_v51, %v3085_v38 }
0x122d   :  { %v1647_v55 = vsel %vm283_vm8, %v1639_v53, 0.0  ;;  %v1640_v56 = vsel %vm283_vm8, %v1638_v54, 0.0 }
0x122e   :  { %v1648_v57 = vrot.slane %v1647_v55, 4  ;;  %v1641_v58 = vrot.slane %v1640_v56, 4 }
0x1230   :  { %v1649_v22 = vadd.f32 %v1648_v57, %v1647_v55  ;;  %v1642_v60 = vadd.f32 %v1641_v58, %v1640_v56 }
0x1232   :  { %v1650_v61 = vrot.slane %v1649_v22, 2  ;;  %v1643_v62 = vrot.slane %v1642_v60, 2 }
0x1234   :  { %v1651_v63 = vadd.f32 %v1650_v61, %v1649_v22  ;;  %v1644_v4 = vadd.f32 %v1643_v62, %v1642_v60 }
0x1236   :  { %v1652_v5 = vrot.slane %v1651_v63, 1  ;;  %v1645_v6 = vrot.slane %v1644_v4, 1 }
0x1238   :  { %v1653_v7 = vadd.f32 %v1652_v5, %v1651_v63  ;;  %v1646_v8 = vadd.f32 %v1645_v6, %v1644_v4 }
0x123a   :  { %v1655_v9 = vpack.c.bf16 %v1653_v7, %v1653_v7  ;;  %v1654_v12 = vpack.c.bf16 %v1646_v8, %v1646_v8 }
0x123c   :  { %v1659_v17 = vunpack.c.l.b16 %v1655_v9  ;;  %v1658_v14 = vunpack.c.l.b16 %v1654_v12 }
0x123e   :  { %v1660_v16 = vsel %vm60_vm7, %v1659_v17, %v1658_v14 }
0x123f   :  { %v1661_v19 = vpack.c.b16 %v1660_v16, %v1660_v16 }
0x1241   :  { %2667 = vmatmul.mubr.msk.bf16.vlgmr.msra.gmra.mrb[44].mxu0 %vm283_vm8, %v1661_v19 }
0x1242   :  { %2677 = vmatpush3.bf16.msra.mxu0 %v2764_v18  ;;  %2678 = vmatprep.mubr.msk.bf16.mxu0 %vm2846_vm1, %v2845_v1 }
0x1243   :  { %2688 = vmatprep.subr.bf16.mxu0 %v2845_v1 }
0x1249   :  { %2679 = vmatmul.mubr.msk.bf16.vlgmr.msra.gmra.mrb[48].mxu0 %vm63_vm3, %v1413_v20 }
0x124a   :  { %2689 = vmatpush3.bf16.msra.mxu0 %v3105_v59  ;;  %2690 = vmatprep.mubr.msk.bf16.mxu0 %vm2846_vm1, %v2845_v1 }
0x124b   :  { %2702 = vmatprep.subr.bf16.mxu0 %v2845_v1 }
0x1314   :  { %v1699_v21 = vpop.f32.mrb[44].mxu0 }
0x1315   :  { %v1700_v24 = vadd.f32 %v1699_v21, %v3192_v29  ;;  %v2668_v25 = vpop.f32.mrb[45].mxu0  ;;  %v2765_v29 = vld [vmem:[#allocation2 + $0xb8] sm:$0xff]  }
0x1316   :  { %v1702_v10 = vpop.f32.mrb[46].mxu0  ;;  %2671 = vmatpush3.bf16.msra.mxu1 %v2765_v29 }
0x1317   :  { %v2669_v28 = vpop.f32.mrb[47].mxu0  ;;  %v1705_v30 = vadd.f32 %v1700_v24, %v3093_v45  ;;  %2682 = vmatprep.subr.bf16.mxu1 %v2845_v1 }
0x1319   :  { %v1706_v31 = vsel %vm1401_vm14, %v1705_v30, -inf }
0x131a   :  { %1707 = vmax.xlane.f32.xlu1 %v1706_v31 }
0x131c   :  { %v1810_v13 = vpop.f32.mrb[48].mxu0 }
0x131d   :  { %v2680_v33 = vpop.f32.mrb[49].mxu0 }
0x131e   :  { %v1813_v35 = vpop.f32.mrb[50].mxu0 }
0x131f   :  { %v2681_v59 = vpop.f32.mrb[51].mxu0 }
0x13a7   :  { %v1708_v40 = vpop.xlane.xlu1 %1707 }
0x13a8   :  { %v1709_v43 = vsub.f32 %v1705_v30, %v1708_v40 }
0x13aa   :  { %v1710_v46 = vmul.f32 1.442695, %v1709_v43 }
0x13ac   :  { %2791 = vpow2.f32 %v1710_v46 }
0x13b6   :  { %v2792_v48 = vpop.eup %2791 }
0x13b7   :  { %v1712_v49 = vsel %vm1401_vm14, %v2792_v48, 0.0 }
0x13b8   :  { %1713 = vadd.xlane.f32.xlu0 %v1712_v49 }
0x1445   :  { %v1714_v50 = vpop.xlane.xlu0 %1713 }
0x1446   :  { %2793 = vrcp.f32 %v1714_v50 }
0x1450   :  { %v2794_v51 = vpop.eup %2793 }
0x1451   :  { %v1716_v53 = vmul.f32 %v2794_v51, %v2792_v48 }
0x1453   :  { %v1816_v54 = vsel %vm1401_vm14, %v1716_v53, -inf  ;;  %v1717_v55 = vpack.c.bf16 %v1716_v53, %v1716_v53 }
0x1454   :  { %1817 = vmax.xlane.f32.xlu1 %v1816_v54 }
0x1455   :  { %2673 = vmatmul.mubr.msk.bf16.vlgmr.msra.gmra.mrb[44].mxu1 %vm63_vm3, %v1717_v55 }
0x1456   :  { %2683 = vmatpush3.bf16.msra.mxu1 %v3096_v52  ;;  %2684 = vmatprep.mubr.msk.bf16.mxu1 %vm2846_vm1, %v2845_v1 }
0x1457   :  { %2694 = vmatprep.subr.bf16.mxu1 %v2845_v1 }
0x14e1   :  { %v1818_v56 = vpop.xlane.xlu1 %1817 }
0x14e2   :  { %vm1819_vm2 = vcmp.ge.f32.partialorder %v1716_v53, %v1818_v56 }
0x14e3   :  { %v1820_v57 = vsel %vm1819_vm2, %v39_v15, 16.0 }
0x14e4   :  { %v1821_v58 = vsel %vm1401_vm14, %v1820_v57, inf }
0x14e5   :  { %1822 = vmin.xlane.f32.xlu1 %v1821_v58 }
0x1528   :  { %v1761_v22 = vpop.f32.mrb[44].mxu1 }
0x1529   :  { %v3247_v60 = vadd.f32 %v1810_v13, %v1761_v22  ;;  %v2674_v61 = vpop.f32.mrb[45].mxu1 }
0x152a   :  { %v1764_v62 = vpop.f32.mrb[46].mxu1 }
0x152b   :  { %v2675_v63 = vpop.f32.mrb[47].mxu1 }
0x1572   :  { %v1823_v52 = vpop.xlane.xlu1 %1822 }
0x1573   :  { %v2716_v4 = vtrunc.f32 %v1823_v52 }
0x1575   :  { %v2717_v5 = vcvt.f32.s32 %v2716_v4 }
0x1577   :  { %vm1825_vm4 = vcmp.eq.s32.totalorder %v2917_v11, %v2717_v5 }
0x1578   :  { %v2425_v6 = vsel %vm1825_vm4, 1.0, %v2845_v1 }
0x1579   :  { %v1828_v7 = vpack.c.bf16 %v2425_v6, %v2425_v6 }
0x157b   :  { %2685 = vmatmul.mubr.msk.bf16.vlgmr.msra.gmra.mrb[48].mxu1 %vm63_vm3, %v1828_v7  ;;  %2691 = vmatmul.mubr.msk.bf16.vlgmr.msra.gmra.mrb[52].mxu0 %vm63_vm3, %v1828_v7 }
0x157c   :  { %2695 = vmatpush3.bf16.msra.mxu1 %v3064_v34  ;;  %2698 = vmatprep.mubr.msk.bf16.mxu1 %vm2846_vm1, %v2845_v1 }
0x157d   :  { %2696 = vmatprep.subr.bf16.mxu1 %v2845_v1  ;;  %2704 = vmatprep.mubr.msk.bf16.mxu0 %vm2846_vm1, %v2845_v1 }
0x1580   :  { %2697 = vmatpush3.bf16.msra.mxu1 %v3071_v36 }
0x1581   :  { %2708 = vmatprep.subr.bf16.mxu1 %v2845_v1 }
0x164e   :  { %v1866_v15 = vpop.f32.mrb[48].mxu1  ;;  %v3261_v8 = vpop.f32.mrb[52].mxu0 }
0x164f   :  { %v1919_v9 = vrot.slane %v1866_v15, %v3117_v3  ;;  %v2686_v12 = vpop.f32.mrb[49].mxu1  ;;  %v2692_v17 = vpop.f32.mrb[53].mxu0 }
0x1650   :  { %v1869_v34 = vpop.f32.mrb[50].mxu1  ;;  %v1909_v14 = vpop.f32.mrb[54].mxu0  ;;  %v2813_v12 = vld [vmem:[%s3347_s0] sm:$0x3] }
0x1651   :  { %v1920_v16 = vcombine.high %v1919_v9, %v1919_v9  ;;  %v1927_v18 = vrot.slane %v1919_v9, %v3117_v3  ;;  %v2687_v19 = vpop.f32.mrb[51].mxu1  ;;  %v2693_v20 = vpop.f32.mrb[55].mxu0  ;;  %v2855_v9 = vmov 11  }
0x1653   :  { %v1934_v21 = vrot.slane %v1920_v16, %v3117_v3  ;;  %v1938_v36 = vrot.slane %v1927_v18, %v2978_v23 }
0x1655   :  { %v1945_v24 = vmul.f32 %v1938_v36, %v3083_v37  ;;  %v1942_v25 = vrot.slane %v1934_v21, %v2978_v23 }
0x1657   :  { %v1947_v10 = vsel %vm283_vm8, %v1945_v24, 0.0  ;;  %v1946_v28 = vmul.f32 %v1942_v25, %v3087_v41 }
0x1658   :  { %1948 = vadd.xlane.f32.xlu0 %v1947_v10 }
0x1659   :  { %v1950_v30 = vsel %vm283_vm8, %v1946_v28, 0.0 }
0x165a   :  { %1951 = vadd.xlane.f32.xlu1 %v1950_v30 }
0x16e5   :  { %v1949_v31 = vpop.xlane.xlu0 %1948 }
0x16e6   :  { %v1953_v13 = vmul.f32 0.17677669, %v1949_v31 }
0x16e7   :  { %v1952_v33 = vpop.xlane.xlu1 %1951 }
0x16e8   :  { %v1955_v35 = vadd.f32 %v1953_v13, %v3135_v39  ;;  %v1954_v59 = vmul.f32 0.17677669, %v1952_v33 }
0x16ea   :  { %v1956_v40 = vadd.f32 %v1954_v59, %v3138_v44  ;;  %1960 = vperm.xlu0 %2738, %v1955_v35  }
0x16ec   :  { %1963 = vperm.xlu1 %2739, %v1956_v40  }
0x1769   :  { %v1961_v37 = vpop.permute.xlu0 %1960 }
0x176a   :  { %v1968_v46 = vrot.slane %v1961_v37, %v3143_v47 }
0x176b   :  { %v1964_v43 = vpop.permute.xlu1 %1963 }
0x176c   :  { %v1972_v41 = vrot.slane %v1964_v43, %v3143_v47 }
0x176e   :  { %v1973_v48 = vsel %vm60_vm7, %v1972_v41, %v1968_v46  ;;  %v2814_v41 = vld [vmem:[#allocation2] sm:$0xff]  }
0x176f   :  { %v1975_v49 = vsel %vm1267_vm13, %v1973_v48, -inf }
0x1770   :  { %1976 = vmax.xlane.f32.xlu1 %v1975_v49 }
0x17fd   :  { %v1977_v29 = vpop.xlane.xlu1 %1976 }
0x17fe   :  { %v1982_v50 = vrot.slane %v1977_v29, %v2978_v23  ;;  %v1986_v39 = vrot.slane %v1977_v29, %v2987_v32 }
0x1800   :  { %v1989_v51 = vsub.f32 %v1955_v35, %v1982_v50  ;;  %v1990_v44 = vsub.f32 %v1956_v40, %v1986_v39 }
0x1802   :  { %v1991_v53 = vmul.f32 1.442695, %v1989_v51  ;;  %v1993_v54 = vmul.f32 1.442695, %v1990_v44 }
0x1804   :  { %2795 = vpow2.f32 %v1991_v53 }
0x1805   :  { %2797 = vpow2.f32 %v1993_v54 }
0x180e   :  { %v2796_v55 = vpop.eup %2795 }
0x180f   :  { %1998 = vperm.xlu0 %2738, %v2796_v55   ;;  %v2798_v56 = vpop.eup %2797 }
0x1813   :  { %2001 = vperm.xlu0 %2738, %v2798_v56  }
0x188e   :  { %v1999_v57 = vpop.permute.xlu0 %1998 }
0x188f   :  { %v2006_v22 = vrot.slane %v1999_v57, %v3143_v47 }
0x1892   :  { %v2002_v58 = vpop.permute.xlu0 %2001 }
0x1893   :  { %v2010_v61 = vrot.slane %v2002_v58, %v3143_v47 }
0x1895   :  { %v2011_v62 = vsel %vm60_vm7, %v2010_v61, %v2006_v22 }
0x1896   :  { %v2013_v63 = vsel %vm1267_vm13, %v2011_v62, 0.0 }
0x1897   :  { %2014 = vadd.xlane.f32.xlu0 %v2013_v63 }
0x1924   :  { %v2015_v52 = vpop.xlane.xlu0 %2014 }
0x1925   :  { %2799 = vrcp.f32 %v2015_v52  ;;  %v2270_v52 = vmul.f32 %v3045_v26, %v3045_v26 }
0x192f   :  { %v2800_v4 = vpop.eup %2799 }
0x1930   :  { %v2025_v5 = vrot.slane %v2800_v4, %v2987_v32  ;;  %v2021_v6 = vrot.slane %v2800_v4, %v2978_v23  ;;  %v2272_v4 = vsel %vm283_vm8, %v2270_v52, 0.0 }
0x1932   :  { %v2029_v7 = vmul.f32 %v2798_v56, %v2025_v5  ;;  %v2028_v15 = vmul.f32 %v2796_v55, %v2021_v6  ;;  %v2271_v5 = vmul.f32 %v3047_v27, %v3047_v27 }
0x1934   :  { %2037 = vperm.xlu0 %2738, %v2029_v7   ;;  %2032 = vperm.xlu1 %2739, %v2028_v15   ;;  %v2275_v7 = vsel %vm283_vm8, %v2271_v5, 0.0 }
0x1938   :  { %2740 = vset.pattern.permute.xlu0 %v2855_v9 }
0x1939   :  { %2177 = vperm.xlu0 %2740, %v2813_v12  }
0x193d   :  { %2741 = vset.pattern.permute.xlu0 %v2844_v0 }
0x19b3   :  { %v2038_v17 = vpop.permute.xlu0 %2037  ;;  %v2033_v34 = vpop.permute.xlu1 %2032 }
0x19b4   :  { %v2041_v14 = vmul.f32 %v2038_v17, %v3089_v42  ;;  %v2040_v16 = vmul.f32 %v2033_v34, %v3085_v38 }
0x19b6   :  { %v2049_v18 = vsel %vm283_vm8, %v2041_v14, 0.0  ;;  %v2042_v19 = vsel %vm283_vm8, %v2040_v16, 0.0 }
0x19b7   :  { %v2050_v20 = vrot.slane %v2049_v18, 4  ;;  %v2043_v21 = vrot.slane %v2042_v19, 4 }
0x19b8   :  { %v2178_v40 = vpop.permute.xlu0 %2177 }
0x19b9   :  { %v2051_v36 = vadd.f32 %v2050_v20, %v2049_v18  ;;  %v2044_v24 = vadd.f32 %v2043_v21, %v2042_v19  ;;  %vm2179_vm5 = vcmp.eq.s32.totalorder %v2917_v11, %v2178_v40  ;;  %v2815_v11 = vld [vmem:[%s3348_s1 + $0x8] sm:$0x3] }
0x19ba   :  { %v2432_v46 = vsel %vm2179_vm5, 1.0, %v2845_v1  ;;  %v2183_v39 = vrot.slane %v2815_v11, 1 }
0x19bb   :  { %v2052_v25 = vrot.slane %v2051_v36, 2  ;;  %v2045_v10 = vrot.slane %v2044_v24, 2  ;;  %v2182_v48 = vpack.c.bf16 %v2432_v46, %v2432_v46 }
0x19bd   :  { %v2053_v28 = vadd.f32 %v2052_v25, %v2051_v36  ;;  %v2046_v30 = vadd.f32 %v2045_v10, %v2044_v24  ;;  %v2766_v36 = vld [vmem:[#allocation2 + $0xc0] sm:$0xff]  }
0x19be   :  { %2703 = vmatpush3.bf16.msra.mxu0 %v2766_v36 }
0x19bf   :  { %v2054_v31 = vrot.slane %v2053_v28, 1  ;;  %v2047_v0 = vrot.slane %v2046_v30, 1 }
0x19c1   :  { %v2055_v13 = vadd.f32 %v2054_v31, %v2053_v28  ;;  %v2048_v33 = vadd.f32 %v2047_v0, %v2046_v30  ;;  %v2431_v30 = vld [vmem:[%s3350_s3 + $0x4] ss:$0 sm:$0xff] }
0x19c3   :  { %v2057_v35 = vpack.c.bf16 %v2055_v13, %v2055_v13  ;;  %v2056_v42 = vpack.c.bf16 %v2048_v33, %v2048_v33 }
0x19c5   :  { %v2061_v59 = vunpack.c.l.b16 %v2057_v35  ;;  %v2060_v38 = vunpack.c.l.b16 %v2056_v42 }
0x19c7   :  { %v2062_v37 = vsel %vm60_vm7, %v2061_v59, %v2060_v38 }
0x19c8   :  { %v2063_v43 = vpack.c.b16 %v2062_v37, %v2062_v37 }
0x19ca   :  { %2699 = vmatmul.mubr.msk.bf16.vlgmr.msra.gmra.mrb[52].mxu1 %vm283_vm8, %v2063_v43 }
0x19cb   :  { %2709 = vmatpush3.bf16.msra.mxu1 %v2814_v41  ;;  %2710 = vmatprep.mubr.msk.bf16.mxu1 %vm2846_vm1, %v2845_v1  ;;  %v2816_v1 = vld [vmem:[%s3348_s1 + $0x18] sm:$0x3]  ;;  %vm2279_vm1 = vcmask 254976  }
0x19cc   :  { %v2184_v55 = vsel %vm60_vm7, %v2816_v1, %v2183_v39 }
0x19d2   :  { %2711 = vmatmul.mubr.msk.bf16.vlgmr.msra.gmra.mrb[56].mxu1 %vm63_vm3, %v2182_v48 }
0x1a9d   :  { %v2101_v49 = vpop.f32.mrb[52].mxu1 }
0x1a9e   :  { %v2102_v29 = vadd.f32 %v2101_v49, %v3261_v8  ;;  %v2700_v50 = vpop.f32.mrb[53].mxu1 }
0x1a9f   :  { %v2104_v51 = vpop.f32.mrb[54].mxu1 }
0x1aa0   :  { %v2701_v44 = vpop.f32.mrb[55].mxu1  ;;  %v2107_v53 = vadd.f32 %v2102_v29, %v3093_v45 }
0x1aa2   :  { %v2108_v54 = vsel %vm1401_vm14, %v2107_v53, -inf }
0x1aa3   :  { %2109 = vmax.xlane.f32.xlu1 %v2108_v54 }
0x1aa5   :  { %v2223_v8 = vpop.f32.mrb[56].mxu1 }
0x1aa6   :  { %v2224_v56 = vadd.f32 %v2223_v8, %v2184_v55  ;;  %v2712_v57 = vpop.f32.mrb[57].mxu1 }
0x1aa7   :  { %v2226_v58 = vpop.f32.mrb[58].mxu1 }
0x1aa8   :  { %v2236_v22 = vrot.slane %v2224_v56, %v3117_v3  ;;  %v2278_v61 = vmul.f32 %v2224_v56, %v2224_v56  ;;  %v2713_v62 = vpop.f32.mrb[59].mxu1 }
0x1aaa   :  { %v2244_v45 = vrot.slane %v2236_v22, %v3117_v3  ;;  %v2280_v63 = vsel %vm2279_vm1, %v2278_v61, 0.0  ;;  %v2237_v14 = vcombine.high %v2236_v22, %v2236_v22 }
0x1aab   :  { %2281 = vadd.xlane.f32.xlu1 %v2280_v63 }
0x1aac   :  { %v2255_v6 = vrot.slane %v2244_v45, %v2978_v23  ;;  %v2251_v16 = vrot.slane %v2237_v14, %v3117_v3 }
0x1aae   :  { %v2262_v15 = vmul.f32 %v2255_v6, %v3045_v26  ;;  %v2259_v18 = vrot.slane %v2251_v16, %v2978_v23 }
0x1aaf   :  { %2273 = vadd.xlane.f32.xlu1 %v2272_v4 }
0x1ab0   :  { %v2264_v9 = vsel %vm283_vm8, %v2262_v15, 0.0  ;;  %v2263_v21 = vmul.f32 %v2259_v18, %v3047_v27 }
0x1ab2   :  { %v2267_v26 = vsel %vm283_vm8, %v2263_v21, 0.0 }
0x1ab3   :  { %2276 = vadd.xlane.f32.xlu1 %v2275_v7 }
0x1ab7   :  { %2265 = vadd.xlane.f32.xlu1 %v2264_v9 }
0x1b30   :  { %v2110_v12 = vpop.xlane.xlu1 %2109 }
0x1b31   :  { %v2111_v17 = vsub.f32 %v2107_v53, %v2110_v12 }
0x1b33   :  { %v2112_v34 = vmul.f32 1.442695, %v2111_v17 }
0x1b35   :  { %2801 = vpow2.f32 %v2112_v34 }
0x1b38   :  { %v2282_v38 = vpop.xlane.xlu1 %2281 }
0x1b39   :  { %v2287_v40 = vrot.slane %v2282_v38, %v2978_v23  ;;  %v2291_v46 = vrot.slane %v2282_v38, %v2987_v32 }
0x1b3c   :  { %v2274_v37 = vpop.xlane.xlu1 %2273 }
0x1b3d   :  { %v2294_v43 = vmul.f32 %v2287_v40, %v2274_v37 }
0x1b3f   :  { %v2802_v19 = vpop.eup %2801 }
0x1b40   :  { %v2114_v20 = vsel %vm1401_vm14, %v2802_v19, 0.0  ;;  %v2277_v41 = vpop.xlane.xlu1 %2276 }
0x1b41   :  { %2115 = vadd.xlane.f32.xlu0 %v2114_v20  ;;  %v2295_v48 = vmul.f32 %v2291_v46, %v2277_v41 }
0x1b43   :  { %v2297_v49 = vmax.f32 %v2295_v48, 1e-16 }
0x1b44   :  { %v2266_v50 = vpop.xlane.xlu1 %2265 }
0x1b45   :  { %2268 = vadd.xlane.f32.xlu0 %v2267_v26 }
0x1bce   :  { %v2116_v24 = vpop.xlane.xlu0 %2115 }
0x1bcf   :  { %2803 = vrcp.f32 %v2116_v24 }
0x1bd2   :  { %v2269_v39 = vpop.xlane.xlu0 %2268 }
0x1bd9   :  { %v2804_v25 = vpop.eup %2803 }
0x1bda   :  { %v2118_v10 = vmul.f32 %v2804_v25, %v2802_v19 }
0x1bdc   :  { %v2119_v28 = vpack.c.bf16 %v2118_v10, %v2118_v10 }
0x1bde   :  { %2705 = vmatmul.mubr.msk.bf16.vlgmr.msra.gmra.mrb[56].mxu0 %vm63_vm3, %v2119_v28 }
0x1cb1   :  { %v2163_v3 = vpop.f32.mrb[56].mxu0 }
0x1cb2   :  { %v2169_v27 = vadd.f32 %v2163_v3, %v3247_v60  ;;  %v2706_v31 = vpop.f32.mrb[57].mxu0  ;;  %v2296_v60 = vmax.f32 %v2294_v43, 1e-16 }
0x1cb3   :  { %v2166_v0 = vpop.f32.mrb[58].mxu0 }
0x1cb4   :  { %v2175_v13 = vadd.f32 %v2431_v30, %v2169_v27  ;;  %v2707_v33 = vpop.f32.mrb[59].mxu0  ;;  %2805 = vrsqrt.f32 %v2296_v60 }
0x1cb5   :  { %2807 = vrsqrt.f32 %v2297_v49 }
0x1cb6   :  { %v2304_v35 = vmul.f32 0.3, %v2175_v13 }
0x1cb8   :  { %v2316_v42 = vrot.slane %v2304_v35, %v2987_v32  ;;  %v2309_v59 = vrot.slane %v2304_v35, %v2978_v23 }
0x1cba   :  { %2318 = vbcast.lane.b32.xlu0 %v2316_v42, 256  ;;  %2311 = vbcast.lane.b32.xlu1 %v2309_v59, 256 }
0x1cbe   :  { %v2806_v29 = vpop.eup %2805 }
0x1cbf   :  { %v2300_v11 = vmul.f32 %v2806_v29, %v2266_v50  ;;  %v2808_v51 = vpop.eup %2807 }
0x1cc0   :  { %v2301_v53 = vmul.f32 %v2808_v51, %v2269_v39 }
0x1cc1   :  { %v2302_v44 = vmul.f32 0.7, %v2300_v11 }
0x1cc2   :  { %v2303_v55 = vmul.f32 0.7, %v2301_v53 }
0x1d2c   :  { %v2312_v54 = vpop.permute.xlu1 %2311  ;;  %v2319_v23 = vpop.permute.xlu0 %2318 }
0x1d2d   :  { %v2322_v1 = vadd.f32 %v2312_v54, %v2302_v44  ;;  %v2323_v8 = vadd.f32 %v2319_v23, %v2303_v55 }
0x1d2f   :  { %2327 = vperm.xlu1 %2739, %v2322_v1  }
0x1d33   :  { %2330 = vperm.xlu1 %2739, %v2323_v8  }
0x1dae   :  { %v2328_v32 = vpop.permute.xlu1 %2327 }
0x1daf   :  { %v2335_v57 = vrot.slane %v2328_v32, %v3143_v47 }
0x1db2   :  { %v2331_v56 = vpop.permute.xlu1 %2330 }
0x1db3   :  { %v2339_v58 = vrot.slane %v2331_v56, %v3143_v47 }
0x1db5   :  { %v2340_v22 = vsel %vm60_vm7, %v2339_v58, %v2335_v57 }
0x1db6   :  { %v2342_v61 = vsel %vm1089_vm12, %v2340_v22, -1e+10 }
0x1db7   :  { %v2343_v62 = vsel %vm1267_vm13, %v2342_v61, -inf }
0x1db8   :  { %2344 = vmax.xlane.f32.xlu0 %v2343_v62 }
0x1e45   :  { %v2345_v45 = vpop.xlane.xlu0 %2344 }
0x1e46   :  { %v2346_v63 = vsub.f32 %v2342_v61, %v2345_v45 }
0x1e48   :  { %v2347_v52 = vmul.f32 1.442695, %v2346_v63 }
0x1e4a   :  { %2809 = vpow2.f32 %v2347_v52 }
0x1e54   :  { %v2810_v4 = vpop.eup %2809 }
0x1e55   :  { %v2349_v5 = vsel %vm1267_vm13, %v2810_v4, 0.0 }
0x1e56   :  { %2350 = vadd.xlane.f32.xlu1 %v2349_v5 }
0x1ee3   :  { %v2351_v6 = vpop.xlane.xlu1 %2350 }
0x1ee4   :  { %2811 = vlog2.f32 %v2351_v6 }
0x1eee   :  { %v2812_v7 = vpop.eup %2811 }
0x1eef   :  { %v2353_v47 = vmul.f32 0.6931472, %v2812_v7 }
0x1ef1   :  { %v2354_v15 = vsub.f32 %v2346_v63, %v2353_v47 }
0x1ef3   :  { %2355 = vst.msk [vmem:[%s3351_s4] sm:$0x3] %vm1267_vm13, %v2354_v15 }
0x1ef4   :  { %2360 = vsyncpa [#allocation3], 1 }

</bundles_post_ra>
